<compile_context>
chip_gen: v7x
topology: tpu7x:2x2x1
jax: 0.10.0
libtpu: 0.0.40
codegen_flags: <defaults>
</compile_context>

<pallas_src>
import functools

import jax
import jax.numpy as jnp
import numpy as np
from jax.experimental import pallas as pl
from jax.experimental.pallas import tpu as pltpu

_VMEM_LIMIT = 48 * 1024 * 1024  # explicit scoped-VMEM cap; safe on v5e/v6e/v7x


def _rup(x, m):
    return ((x + m - 1) // m) * m


# ----------------------------------------------------------------------------
# Kernel bodies
# ----------------------------------------------------------------------------
def _proj_kernel(x_ref, w_ref, o_ref):
    """o = x @ w  (row-tiled feature projection, bf16 in / f32 acc / bf16 out)."""
    o_ref[...] = jnp.dot(
        x_ref[...], w_ref[...], preferred_element_type=jnp.float32
    ).astype(o_ref.dtype)


def _aggregate_kernel(adj_ref, x_ref, o_ref, acc_ref, *, apply_relu):
    """o[i] = act( sum_k adj[i,k] @ x[k] )  with f32 accumulator scratch."""
    k = pl.program_id(1)

    @pl.when(k == 0)
    def _init():
        acc_ref[...] = jnp.zeros_like(acc_ref)

    acc_ref[...] += jnp.dot(
        adj_ref[...], x_ref[...], preferred_element_type=jnp.float32
    )

    @pl.when(k == pl.num_programs(1) - 1)
    def _finalize():
        r = acc_ref[...]
        if apply_relu:
            r = jnp.maximum(r, 0.0)
        o_ref[...] = r.astype(o_ref.dtype)


def _aggregate_reparam_kernel(adj_ref, hw_ref, noise_ref, z32_ref, zbf_ref,
                              acc_ref, *, hid2p):
    """[mean|logstd][i] = sum_k adj[i,k] @ hw[k]; then Z = noise*exp(logstd)+mean.

    hid2p is a multiple of 128, so the head split is on a lane boundary.
    """
    k = pl.program_id(1)

    @pl.when(k == 0)
    def _init():
        acc_ref[...] = jnp.zeros_like(acc_ref)

    acc_ref[...] += jnp.dot(
        adj_ref[...], hw_ref[...], preferred_element_type=jnp.float32
    )

    @pl.when(k == pl.num_programs(1) - 1)
    def _finalize():
        ms = acc_ref[...]
        mean = ms[:, :hid2p]
        logstd = ms[:, hid2p:]
        z = noise_ref[...] * jnp.exp(logstd) + mean
        z32_ref[...] = z                      # f32 Z for the caller
        zbf_ref[...] = z.astype(zbf_ref.dtype)  # bf16 Z feeding the decoder


def _decode_kernel(zi_ref, zjt_ref, a_ref):
    """A[i,j] = sigmoid(Z[i] @ Z[j].T), using a pre-transposed Z^T tile."""
    logits = jnp.dot(
        zi_ref[...], zjt_ref[...], preferred_element_type=jnp.float32
    )
    # sigmoid in f32 (portable EUP path); bf16 store halves the N^2 HBM write.
    a_ref[...] = jax.nn.sigmoid(logits).astype(a_ref.dtype)


# ----------------------------------------------------------------------------
# pallas_call wrappers
# ----------------------------------------------------------------------------
def _project(x, w, row_tile):
    npad, din = x.shape
    dout = w.shape[1]
    return pl.pallas_call(
        _proj_kernel,
        out_shape=jax.ShapeDtypeStruct((npad, dout), jnp.bfloat16),
        grid=(npad // row_tile,),
        in_specs=[
            pl.BlockSpec((row_tile, din), lambda i: (i, 0)),
            pl.BlockSpec((din, dout), lambda i: (0, 0)),
        ],
        out_specs=pl.BlockSpec((row_tile, dout), lambda i: (i, 0)),
        compiler_params=pltpu.CompilerParams(
            dimension_semantics=("parallel",),
            vmem_limit_bytes=_VMEM_LIMIT,
        ),
    )(x, w)


def _aggregate(adj, x, row_tile, *, apply_relu):
    npad = adj.shape[0]
    d = x.shape[1]
    kernel = functools.partial(_aggregate_kernel, apply_relu=apply_relu)
    return pl.pallas_call(
        kernel,
        out_shape=jax.ShapeDtypeStruct((npad, d), jnp.bfloat16),
        grid=(npad // row_tile, npad // row_tile),
        in_specs=[
            pl.BlockSpec((row_tile, row_tile), lambda i, k: (i, k)),
            pl.BlockSpec((row_tile, d), lambda i, k: (k, 0)),
        ],
        out_specs=pl.BlockSpec((row_tile, d), lambda i, k: (i, 0)),
        scratch_shapes=[pltpu.VMEM((row_tile, d), jnp.float32)],
        compiler_params=pltpu.CompilerParams(
            dimension_semantics=("parallel", "arbitrary"),
            vmem_limit_bytes=_VMEM_LIMIT,
        ),
    )(adj, x)


def _aggregate_reparam(adj, hw, noise, row_tile, hid2p):
    npad = adj.shape[0]
    d = hw.shape[1]  # == 2 * hid2p
    kernel = functools.partial(_aggregate_reparam_kernel, hid2p=hid2p)
    return pl.pallas_call(
        kernel,
        out_shape=(
            jax.ShapeDtypeStruct((npad, hid2p), jnp.float32),   # Z (f32)
            jax.ShapeDtypeStruct((npad, hid2p), jnp.bfloat16),  # Z (bf16)
        ),
        grid=(npad // row_tile, npad // row_tile),
        in_specs=[
            pl.BlockSpec((row_tile, row_tile), lambda i, k: (i, k)),
            pl.BlockSpec((row_tile, d), lambda i, k: (k, 0)),
            pl.BlockSpec((row_tile, hid2p), lambda i, k: (i, 0)),
        ],
        out_specs=(
            pl.BlockSpec((row_tile, hid2p), lambda i, k: (i, 0)),
            pl.BlockSpec((row_tile, hid2p), lambda i, k: (i, 0)),
        ),
        scratch_shapes=[pltpu.VMEM((row_tile, d), jnp.float32)],
        compiler_params=pltpu.CompilerParams(
            dimension_semantics=("parallel", "arbitrary"),
            vmem_limit_bytes=_VMEM_LIMIT,
        ),
    )(adj, hw, noise)


def _decode(zbf, row_tile):
    npad, hid2p = zbf.shape
    zt = zbf.T  # transposed once (tiny [hid2p, N] array), reused by all tiles
    return pl.pallas_call(
        _decode_kernel,
        out_shape=jax.ShapeDtypeStruct((npad, npad), jnp.bfloat16),
        grid=(npad // row_tile, npad // row_tile),
        in_specs=[
            pl.BlockSpec((row_tile, hid2p), lambda i, j: (i, 0)),
            pl.BlockSpec((hid2p, row_tile), lambda i, j: (0, j)),
        ],
        out_specs=pl.BlockSpec((row_tile, row_tile), lambda i, j: (i, j)),
        compiler_params=pltpu.CompilerParams(
            dimension_semantics=("parallel", "parallel"),
            vmem_limit_bytes=_VMEM_LIMIT,
        ),
    )(zbf, zt)


# ----------------------------------------------------------------------------
# Parameter preparation (done ONCE, outside the per-call path)
# ----------------------------------------------------------------------------
def prepare_params(w0, w_mean, w_logstd):
    """Zero-pad dims to multiples of 128, fuse the two heads, cast to bf16."""
    feat_dim, hid1 = w0.shape
    hid2 = w_mean.shape[1]
    featp, hid1p, hid2p = _rup(feat_dim, 128), _rup(hid1, 128), _rup(hid2, 128)

    w0_p = jnp.zeros((featp, hid1p), jnp.float32).at[:feat_dim, :hid1].set(w0)
    wms_p = (
        jnp.zeros((hid1p, 2 * hid2p), jnp.float32)
        .at[:hid1, :hid2].set(w_mean)
        .at[:hid1, hid2p:hid2p + hid2].set(w_logstd)
    )
    return w0_p.astype(jnp.bfloat16), wms_p.astype(jnp.bfloat16)


# ----------------------------------------------------------------------------
# Full forward
# ----------------------------------------------------------------------------
def vgae_forward(feat, adj_1, w0_p, wms_p, noise, *, row_tile=None):
    n, feat_dim = feat.shape
    featp, hid1p = w0_p.shape
    hid2p = wms_p.shape[1] // 2
    hid2 = noise.shape[1]

    if row_tile is None:
        # Small tiles keep double-buffered VMEM footprint well under the v7x
        # 64 MiB physical VMEM while still giving lane-dense (>=128) stores.
        row_tile = 128 if n <= 2048 else (256 if n <= 8192 else 512)
    npad = _rup(n, row_tile)

    bf16 = jnp.bfloat16
    # Zero-padded, bf16 copies of the per-call inputs (zeros are transparent
    # to every matmul / relu / exp in the pipeline).
    feat_b = jnp.zeros((npad, featp), bf16).at[:n, :feat_dim].set(
        feat.astype(bf16))
    adj_b = jnp.zeros((npad, npad), bf16).at[:n, :n].set(adj_1.astype(bf16))
    noise_p = jnp.zeros((npad, hid2p), jnp.float32).at[:n, :hid2].set(noise)

    xw = _project(feat_b, w0_p, row_tile)                    # [npad, hid1p]
    hidden = _aggregate(adj_b, xw, row_tile, apply_relu=True)  # [npad, hid1p]
    hw = _project(hidden, wms_p, row_tile)                   # [npad, 2*hid2p]
    z32, zbf = _aggregate_reparam(adj_b, hw, noise_p, row_tile, hid2p)
    a_pred = _decode(zbf, row_tile)                          # [npad, npad] bf16

    return z32[:n, :hid2], a_pred[:n, :n]


# ----------------------------------------------------------------------------
# Deterministic parameter / input construction (synthetic, no checkpoint)
# ----------------------------------------------------------------------------
def glorot_init(key, in_dim, out_dim):
    init_range = np.sqrt(6.0 / (in_dim + out_dim))
    return jax.random.uniform(
        key, (in_dim, out_dim), jnp.float32, -init_range, init_range)


def normalize_adj(adj):
    """D^{-1/2} A D^{-1/2} of the self-loop-augmented adjacency (adj_1)."""
    deg = jnp.sum(adj, axis=1)
    d_inv_sqrt = jnp.where(deg > 0, 1.0 / jnp.sqrt(deg), 0.0)
    return adj * d_inv_sqrt[:, None] * d_inv_sqrt[None, :]


if __name__ == "__main__":
    key = jax.random.PRNGKey(0)
    k_adj, k_feat, k_w0, k_wm, k_ws, k_noise = jax.random.split(key, 6)

    # Small synthetic graph (also exercises row / feature / head padding).
    N, FEAT_DIM, HID1, HID2 = 200, 96, 64, 16

    a_rand = jax.random.uniform(k_adj, (N, N))
    a_bin = (a_rand + a_rand.T > 1.4).astype(jnp.float32)
    adj = a_bin * (1.0 - jnp.eye(N)) + jnp.eye(N)           # adj + I
    adj_1 = normalize_adj(adj).astype(jnp.float32)

    feat = jax.random.normal(k_feat, (N, FEAT_DIM), jnp.float32)
    w0 = glorot_init(k_w0, FEAT_DIM, HID1)
    w_mean = glorot_init(k_wm, HID1, HID2)
    w_logstd = glorot_init(k_ws, HID1, HID2)
    noise = jax.random.normal(k_noise, (N, HID2), jnp.float32)  # torch.randn

    w0_p, wms_p = prepare_params(w0, w_mean, w_logstd)       # hoisted (once)

    fwd = jax.jit(vgae_forward)
    sampled_z, a_pred = fwd(feat, adj_1, w0_p, wms_p, noise)
    jax.block_until_ready((sampled_z, a_pred))

    # Reference mirroring the kernel's numerics (bf16 operands, f32 accum).
    bf, f32 = jnp.bfloat16, jnp.float32
    adj_b, feat_b = adj_1.astype(bf), feat.astype(bf)
    w0_b, wm_b, ws_b = w0.astype(bf), w_mean.astype(bf), w_logstd.astype(bf)
    xw_r = jnp.dot(feat_b, w0_b, preferred_element_type=f32).astype(bf)
    hid_r = jnp.maximum(
        jnp.dot(adj_b, xw_r, preferred_element_type=f32), 0.0).astype(bf)
    mean_r = jnp.dot(
        adj_b, jnp.dot(hid_r, wm_b, preferred_element_type=f32).astype(bf),
        preferred_element_type=f32)
    logstd_r = jnp.dot(
        adj_b, jnp.dot(hid_r, ws_b, preferred_element_type=f32).astype(bf),
        preferred_element_type=f32)
    z_r = noise * jnp.exp(logstd_r) + mean_r
    zb_r = z_r.astype(bf)
    a_r = jax.nn.sigmoid(jnp.dot(zb_r, zb_r.T, preferred_element_type=f32))

    assert sampled_z.shape == (N, HID2) and a_pred.shape == (N, N)
    assert jnp.allclose(sampled_z, z_r, atol=2e-2, rtol=2e-2)
    assert jnp.allclose(a_pred.astype(f32), a_r, atol=2e-2, rtol=2e-2)

    print("KERNEL_OK")
</pallas_src>

<mosaic_0001>
module attributes {stable_mosaic.version = 11 : i64} {
  func.func @_proj_kernel(%arg0: i32, %arg1: memref<128x128xbf16, #tpu.memory_space<vmem>>, %arg2: memref<128x128xbf16, #tpu.memory_space<vmem>>, %arg3: memref<128x128xbf16, #tpu.memory_space<vmem>>) attributes {dimension_semantics = [#tpu.dimension_semantics<parallel>], iteration_bounds = array<i64: 2>, scalar_prefetch = 0 : i64, scratch_operands = 0 : i64, tpu.core_type = #tpu.core_type<tc>, window_params = [{transform_indices = @transform_0, window_bounds = array<i64: 128, 128>}, {pipeline_mode = #tpu.pipeline_mode<synchronous>, transform_indices = @transform_1, window_bounds = array<i64: 128, 128>}, {transform_indices = @transform_2, window_bounds = array<i64: 128, 128>}]} {
    %c0 = arith.constant 0 : index
    %c0_0 = arith.constant 0 : index
    %0 = vector.load %arg1[%c0, %c0_0] : memref<128x128xbf16, #tpu.memory_space<vmem>>, vector<128x128xbf16>
    %c0_1 = arith.constant 0 : index
    %c0_2 = arith.constant 0 : index
    %1 = vector.load %arg2[%c0_1, %c0_2] : memref<128x128xbf16, #tpu.memory_space<vmem>>, vector<128x128xbf16>
    %cst = arith.constant dense<0.000000e+00> : vector<128x128xf32>
    %2 = tpu.matmul %0, %1, %cst {dimension_numbers = #tpu.dot_dimension_numbers<[1], [0], [0], [1], [0, 0, 1, 1], [], []>} : vector<128x128xbf16>, vector<128x128xbf16>, vector<128x128xf32> -> vector<128x128xf32>
    %3 = arith.truncf %2 : vector<128x128xf32> to vector<128x128xbf16>
    %c0_3 = arith.constant 0 : index
    %c0_4 = arith.constant 0 : index
    %4 = vector.load %arg3[%c0_3, %c0_4] : memref<128x128xbf16, #tpu.memory_space<vmem>>, vector<128x128xbf16>
    tpu.vector_store %arg3[%c0_3, %c0_4], %3 {strides = array<i32>} : memref<128x128xbf16, #tpu.memory_space<vmem>>, vector<128x128xbf16>,
    return
  }
  func.func @transform_0(%arg0: i32) -> (i32, i32) {
    %c0_i32 = arith.constant 0 : i32
    %c0_i32_0 = arith.constant 0 : i32
    return %arg0, %c0_i32 : i32, i32
  }
  func.func @transform_1(%arg0: i32) -> (i32, i32) {
    %c0_i32 = arith.constant 0 : i32
    %c0_i32_0 = arith.constant 0 : i32
    %c0_i32_1 = arith.constant 0 : i32
    return %c0_i32, %c0_i32_0 : i32, i32
  }
  func.func @transform_2(%arg0: i32) -> (i32, i32) {
    %c0_i32 = arith.constant 0 : i32
    %c0_i32_0 = arith.constant 0 : i32
    return %arg0, %c0_i32 : i32, i32
  }
}

module attributes {stable_mosaic.version = 11 : i64} {
  func.func @_aggregate_kernel(%arg0: i32, %arg1: i32, %arg2: memref<128x128xbf16, #tpu.memory_space<vmem>>, %arg3: memref<128x128xbf16, #tpu.memory_space<vmem>>, %arg4: memref<128x128xbf16, #tpu.memory_space<vmem>>, %arg5: memref<128x128xf32, #tpu.memory_space<vmem>>) attributes {dimension_semantics = [#tpu.dimension_semantics<parallel>, #tpu.dimension_semantics<arbitrary>], iteration_bounds = array<i64: 2, 2>, scalar_prefetch = 0 : i64, scratch_operands = 1 : i64, tpu.core_type = #tpu.core_type<tc>, window_params = [{transform_indices = @transform_0, window_bounds = array<i64: 128, 128>}, {transform_indices = @transform_1, window_bounds = array<i64: 128, 128>}, {transform_indices = @transform_2, window_bounds = array<i64: 128, 128>}]} {
    %c0_i32 = arith.constant 0 : i32
    %0 = arith.cmpi eq, %arg1, %c0_i32 : i32
    %1 = arith.extui %0 : i1 to i32
    %c0_i32_0 = arith.constant 0 : i32
    %2 = arith.cmpi ne, %1, %c0_i32_0 : i32
    scf.if %2 {
      %cst_9 = arith.constant 0.000000e+00 : f32
      %12 = vector.broadcast %cst_9 : f32 to vector<128x128xf32>
      %c0_10 = arith.constant 0 : index
      %c0_11 = arith.constant 0 : index
      %13 = vector.load %arg5[%c0_10, %c0_11] : memref<128x128xf32, #tpu.memory_space<vmem>>, vector<128x128xf32>
      tpu.vector_store %arg5[%c0_10, %c0_11], %12 {strides = array<i32>} : memref<128x128xf32, #tpu.memory_space<vmem>>, vector<128x128xf32>,
    } else {
    }
    %c0 = arith.constant 0 : index
    %c0_1 = arith.constant 0 : index
    %3 = vector.load %arg5[%c0, %c0_1] : memref<128x128xf32, #tpu.memory_space<vmem>>, vector<128x128xf32>
    %c0_2 = arith.constant 0 : index
    %c0_3 = arith.constant 0 : index
    %4 = vector.load %arg2[%c0_2, %c0_3] : memref<128x128xbf16, #tpu.memory_space<vmem>>, vector<128x128xbf16>
    %c0_4 = arith.constant 0 : index
    %c0_5 = arith.constant 0 : index
    %5 = vector.load %arg3[%c0_4, %c0_5] : memref<128x128xbf16, #tpu.memory_space<vmem>>, vector<128x128xbf16>
    %cst = arith.constant dense<0.000000e+00> : vector<128x128xf32>
    %6 = tpu.matmul %4, %5, %cst {dimension_numbers = #tpu.dot_dimension_numbers<[1], [0], [0], [1], [0, 0, 1, 1], [], []>} : vector<128x128xbf16>, vector<128x128xbf16>, vector<128x128xf32> -> vector<128x128xf32>
    %7 = arith.addf %3, %6 : vector<128x128xf32>
    %c0_6 = arith.constant 0 : index
    %c0_7 = arith.constant 0 : index
    %8 = vector.load %arg5[%c0_6, %c0_7] : memref<128x128xf32, #tpu.memory_space<vmem>>, vector<128x128xf32>
    tpu.vector_store %arg5[%c0_6, %c0_7], %7 {strides = array<i32>} : memref<128x128xf32, #tpu.memory_space<vmem>>, vector<128x128xf32>,
    %c1_i32 = arith.constant 1 : i32
    %9 = arith.cmpi eq, %arg1, %c1_i32 : i32
    %10 = arith.extui %9 : i1 to i32
    %c0_i32_8 = arith.constant 0 : i32
    %11 = arith.cmpi ne, %10, %c0_i32_8 : i32
    scf.if %11 {
      %c0_9 = arith.constant 0 : index
      %c0_10 = arith.constant 0 : index
      %12 = vector.load %arg5[%c0_9, %c0_10] : memref<128x128xf32, #tpu.memory_space<vmem>>, vector<128x128xf32>
      %cst_11 = arith.constant 0.000000e+00 : f32
      %13 = vector.broadcast %cst_11 : f32 to vector<128x128xf32>
      %14 = arith.maximumf %12, %13 : vector<128x128xf32>
      %15 = arith.truncf %14 : vector<128x128xf32> to vector<128x128xbf16>
      %c0_12 = arith.constant 0 : index
      %c0_13 = arith.constant 0 : index
      %16 = vector.load %arg4[%c0_12, %c0_13] : memref<128x128xbf16, #tpu.memory_space<vmem>>, vector<128x128xbf16>
      tpu.vector_store %arg4[%c0_12, %c0_13], %15 {strides = array<i32>} : memref<128x128xbf16, #tpu.memory_space<vmem>>, vector<128x128xbf16>,
    } else {
    }
    return
  }
  func.func @transform_0(%arg0: i32, %arg1: i32) -> (i32, i32) {
    %c0_i32 = arith.constant 0 : i32
    return %arg0, %arg1 : i32, i32
  }
  func.func @transform_1(%arg0: i32, %arg1: i32) -> (i32, i32) {
    %c0_i32 = arith.constant 0 : i32
    %c0_i32_0 = arith.constant 0 : i32
    return %arg1, %c0_i32 : i32, i32
  }
  func.func @transform_2(%arg0: i32, %arg1: i32) -> (i32, i32) {
    %c0_i32 = arith.constant 0 : i32
    %c0_i32_0 = arith.constant 0 : i32
    return %arg0, %c0_i32 : i32, i32
  }
}

module attributes {stable_mosaic.version = 11 : i64} {
  func.func @_proj_kernel(%arg0: i32, %arg1: memref<128x128xbf16, #tpu.memory_space<vmem>>, %arg2: memref<128x256xbf16, #tpu.memory_space<vmem>>, %arg3: memref<128x256xbf16, #tpu.memory_space<vmem>>) attributes {dimension_semantics = [#tpu.dimension_semantics<parallel>], iteration_bounds = array<i64: 2>, scalar_prefetch = 0 : i64, scratch_operands = 0 : i64, tpu.core_type = #tpu.core_type<tc>, window_params = [{transform_indices = @transform_0, window_bounds = array<i64: 128, 128>}, {pipeline_mode = #tpu.pipeline_mode<synchronous>, transform_indices = @transform_1, window_bounds = array<i64: 128, 256>}, {transform_indices = @transform_2, window_bounds = array<i64: 128, 256>}]} {
    %c0 = arith.constant 0 : index
    %c0_0 = arith.constant 0 : index
    %0 = vector.load %arg1[%c0, %c0_0] : memref<128x128xbf16, #tpu.memory_space<vmem>>, vector<128x128xbf16>
    %c0_1 = arith.constant 0 : index
    %c0_2 = arith.constant 0 : index
    %1 = vector.load %arg2[%c0_1, %c0_2] : memref<128x256xbf16, #tpu.memory_space<vmem>>, vector<128x256xbf16>
    %cst = arith.constant dense<0.000000e+00> : vector<128x256xf32>
    %2 = tpu.matmul %0, %1, %cst {dimension_numbers = #tpu.dot_dimension_numbers<[1], [0], [0], [1], [0, 0, 1, 1], [], []>} : vector<128x128xbf16>, vector<128x256xbf16>, vector<128x256xf32> -> vector<128x256xf32>
    %3 = arith.truncf %2 : vector<128x256xf32> to vector<128x256xbf16>
    %c0_3 = arith.constant 0 : index
    %c0_4 = arith.constant 0 : index
    %4 = vector.load %arg3[%c0_3, %c0_4] : memref<128x256xbf16, #tpu.memory_space<vmem>>, vector<128x256xbf16>
    tpu.vector_store %arg3[%c0_3, %c0_4], %3 {strides = array<i32>} : memref<128x256xbf16, #tpu.memory_space<vmem>>, vector<128x256xbf16>,
    return
  }
  func.func @transform_0(%arg0: i32) -> (i32, i32) {
    %c0_i32 = arith.constant 0 : i32
    %c0_i32_0 = arith.constant 0 : i32
    return %arg0, %c0_i32 : i32, i32
  }
  func.func @transform_1(%arg0: i32) -> (i32, i32) {
    %c0_i32 = arith.constant 0 : i32
    %c0_i32_0 = arith.constant 0 : i32
    %c0_i32_1 = arith.constant 0 : i32
    return %c0_i32, %c0_i32_0 : i32, i32
  }
  func.func @transform_2(%arg0: i32) -> (i32, i32) {
    %c0_i32 = arith.constant 0 : i32
    %c0_i32_0 = arith.constant 0 : i32
    return %arg0, %c0_i32 : i32, i32
  }
}

module attributes {stable_mosaic.version = 11 : i64} {
  func.func @_aggregate_reparam_kernel(%arg0: i32, %arg1: i32, %arg2: memref<128x128xbf16, #tpu.memory_space<vmem>>, %arg3: memref<128x256xbf16, #tpu.memory_space<vmem>>, %arg4: memref<128x128xf32, #tpu.memory_space<vmem>>, %arg5: memref<128x128xf32, #tpu.memory_space<vmem>>, %arg6: memref<128x128xbf16, #tpu.memory_space<vmem>>, %arg7: memref<128x256xf32, #tpu.memory_space<vmem>>) attributes {dimension_semantics = [#tpu.dimension_semantics<parallel>, #tpu.dimension_semantics<arbitrary>], iteration_bounds = array<i64: 2, 2>, scalar_prefetch = 0 : i64, scratch_operands = 1 : i64, tpu.core_type = #tpu.core_type<tc>, window_params = [{transform_indices = @transform_0, window_bounds = array<i64: 128, 128>}, {transform_indices = @transform_1, window_bounds = array<i64: 128, 256>}, {transform_indices = @transform_2, window_bounds = array<i64: 128, 128>}, {transform_indices = @transform_3, window_bounds = array<i64: 128, 128>}, {transform_indices = @transform_4, window_bounds = array<i64: 128, 128>}]} {
    %c0_i32 = arith.constant 0 : i32
    %0 = arith.cmpi eq, %arg1, %c0_i32 : i32
    %1 = arith.extui %0 : i1 to i32
    %c0_i32_0 = arith.constant 0 : i32
    %2 = arith.cmpi ne, %1, %c0_i32_0 : i32
    scf.if %2 {
      %cst_9 = arith.constant 0.000000e+00 : f32
      %12 = vector.broadcast %cst_9 : f32 to vector<128x256xf32>
      %c0_10 = arith.constant 0 : index
      %c0_11 = arith.constant 0 : index
      %13 = vector.load %arg7[%c0_10, %c0_11] : memref<128x256xf32, #tpu.memory_space<vmem>>, vector<128x256xf32>
      tpu.vector_store %arg7[%c0_10, %c0_11], %12 {strides = array<i32>} : memref<128x256xf32, #tpu.memory_space<vmem>>, vector<128x256xf32>,
    } else {
    }
    %c0 = arith.constant 0 : index
    %c0_1 = arith.constant 0 : index
    %3 = vector.load %arg7[%c0, %c0_1] : memref<128x256xf32, #tpu.memory_space<vmem>>, vector<128x256xf32>
    %c0_2 = arith.constant 0 : index
    %c0_3 = arith.constant 0 : index
    %4 = vector.load %arg2[%c0_2, %c0_3] : memref<128x128xbf16, #tpu.memory_space<vmem>>, vector<128x128xbf16>
    %c0_4 = arith.constant 0 : index
    %c0_5 = arith.constant 0 : index
    %5 = vector.load %arg3[%c0_4, %c0_5] : memref<128x256xbf16, #tpu.memory_space<vmem>>, vector<128x256xbf16>
    %cst = arith.constant dense<0.000000e+00> : vector<128x256xf32>
    %6 = tpu.matmul %4, %5, %cst {dimension_numbers = #tpu.dot_dimension_numbers<[1], [0], [0], [1], [0, 0, 1, 1], [], []>} : vector<128x128xbf16>, vector<128x256xbf16>, vector<128x256xf32> -> vector<128x256xf32>
    %7 = arith.addf %3, %6 : vector<128x256xf32>
    %c0_6 = arith.constant 0 : index
    %c0_7 = arith.constant 0 : index
    %8 = vector.load %arg7[%c0_6, %c0_7] : memref<128x256xf32, #tpu.memory_space<vmem>>, vector<128x256xf32>
    tpu.vector_store %arg7[%c0_6, %c0_7], %7 {strides = array<i32>} : memref<128x256xf32, #tpu.memory_space<vmem>>, vector<128x256xf32>,
    %c1_i32 = arith.constant 1 : i32
    %9 = arith.cmpi eq, %arg1, %c1_i32 : i32
    %10 = arith.extui %9 : i1 to i32
    %c0_i32_8 = arith.constant 0 : i32
    %11 = arith.cmpi ne, %10, %c0_i32_8 : i32
    scf.if %11 {
      %c0_9 = arith.constant 0 : index
      %c0_10 = arith.constant 0 : index
      %12 = vector.load %arg7[%c0_9, %c0_10] : memref<128x256xf32, #tpu.memory_space<vmem>>, vector<128x256xf32>
      %13 = vector.extract_strided_slice %12 {offsets = [0, 0], sizes = [128, 128], strides = [1, 1]} : vector<128x256xf32> to vector<128x128xf32>
      %14 = vector.extract_strided_slice %12 {offsets = [0, 128], sizes = [128, 128], strides = [1, 1]} : vector<128x256xf32> to vector<128x128xf32>
      %c0_11 = arith.constant 0 : index
      %c0_12 = arith.constant 0 : index
      %15 = vector.load %arg4[%c0_11, %c0_12] : memref<128x128xf32, #tpu.memory_space<vmem>>, vector<128x128xf32>
      %16 = math.exp %14 : vector<128x128xf32>
      %17 = arith.mulf %15, %16 : vector<128x128xf32>
      %18 = arith.addf %17, %13 : vector<128x128xf32>
      %c0_13 = arith.constant 0 : index
      %c0_14 = arith.constant 0 : index
      %19 = vector.load %arg5[%c0_13, %c0_14] : memref<128x128xf32, #tpu.memory_space<vmem>>, vector<128x128xf32>
      tpu.vector_store %arg5[%c0_13, %c0_14], %18 {strides = array<i32>} : memref<128x128xf32, #tpu.memory_space<vmem>>, vector<128x128xf32>,
      %20 = arith.truncf %18 : vector<128x128xf32> to vector<128x128xbf16>
      %c0_15 = arith.constant 0 : index
      %c0_16 = arith.constant 0 : index
      %21 = vector.load %arg6[%c0_15, %c0_16] : memref<128x128xbf16, #tpu.memory_space<vmem>>, vector<128x128xbf16>
      tpu.vector_store %arg6[%c0_15, %c0_16], %20 {strides = array<i32>} : memref<128x128xbf16, #tpu.memory_space<vmem>>, vector<128x128xbf16>,
    } else {
    }
    return
  }
  func.func @transform_0(%arg0: i32, %arg1: i32) -> (i32, i32) {
    %c0_i32 = arith.constant 0 : i32
    return %arg0, %arg1 : i32, i32
  }
  func.func @transform_1(%arg0: i32, %arg1: i32) -> (i32, i32) {
    %c0_i32 = arith.constant 0 : i32
    %c0_i32_0 = arith.constant 0 : i32
    return %arg1, %c0_i32 : i32, i32
  }
  func.func @transform_2(%arg0: i32, %arg1: i32) -> (i32, i32) {
    %c0_i32 = arith.constant 0 : i32
    %c0_i32_0 = arith.constant 0 : i32
    return %arg0, %c0_i32 : i32, i32
  }
  func.func @transform_3(%arg0: i32, %arg1: i32) -> (i32, i32) {
    %c0_i32 = arith.constant 0 : i32
    %c0_i32_0 = arith.constant 0 : i32
    return %arg0, %c0_i32 : i32, i32
  }
  func.func @transform_4(%arg0: i32, %arg1: i32) -> (i32, i32) {
    %c0_i32 = arith.constant 0 : i32
    %c0_i32_0 = arith.constant 0 : i32
    return %arg0, %c0_i32 : i32, i32
  }
}

module attributes {stable_mosaic.version = 11 : i64} {
  func.func @_decode_kernel(%arg0: i32, %arg1: i32, %arg2: memref<128x128xbf16, #tpu.memory_space<vmem>>, %arg3: memref<128x128xbf16, #tpu.memory_space<vmem>>, %arg4: memref<128x128xbf16, #tpu.memory_space<vmem>>) attributes {dimension_semantics = [#tpu.dimension_semantics<parallel>, #tpu.dimension_semantics<parallel>], iteration_bounds = array<i64: 2, 2>, scalar_prefetch = 0 : i64, scratch_operands = 0 : i64, tpu.core_type = #tpu.core_type<tc>, window_params = [{transform_indices = @transform_0, window_bounds = array<i64: 128, 128>}, {transform_indices = @transform_1, window_bounds = array<i64: 128, 128>}, {transform_indices = @transform_2, window_bounds = array<i64: 128, 128>}]} {
    %c0 = arith.constant 0 : index
    %c0_0 = arith.constant 0 : index
    %0 = vector.load %arg2[%c0, %c0_0] : memref<128x128xbf16, #tpu.memory_space<vmem>>, vector<128x128xbf16>
    %c0_1 = arith.constant 0 : index
    %c0_2 = arith.constant 0 : index
    %1 = vector.load %arg3[%c0_1, %c0_2] : memref<128x128xbf16, #tpu.memory_space<vmem>>, vector<128x128xbf16>
    %cst = arith.constant dense<0.000000e+00> : vector<128x128xf32>
    %2 = tpu.matmul %0, %1, %cst {dimension_numbers = #tpu.dot_dimension_numbers<[1], [0], [0], [1], [0, 0, 1, 1], [], []>} : vector<128x128xbf16>, vector<128x128xbf16>, vector<128x128xf32> -> vector<128x128xf32>
    %3 = arith.negf %2 : vector<128x128xf32>
    %4 = math.exp %3 : vector<128x128xf32>
    %cst_3 = arith.constant 1.000000e+00 : f32
    %5 = vector.broadcast %cst_3 : f32 to vector<128x128xf32>
    %6 = arith.addf %5, %4 : vector<128x128xf32>
    %7 = arith.divf %5, %6 : vector<128x128xf32>
    %8 = arith.truncf %7 : vector<128x128xf32> to vector<128x128xbf16>
    %c0_4 = arith.constant 0 : index
    %c0_5 = arith.constant 0 : index
    %9 = vector.load %arg4[%c0_4, %c0_5] : memref<128x128xbf16, #tpu.memory_space<vmem>>, vector<128x128xbf16>
    tpu.vector_store %arg4[%c0_4, %c0_5], %8 {strides = array<i32>} : memref<128x128xbf16, #tpu.memory_space<vmem>>, vector<128x128xbf16>,
    return
  }
  func.func @transform_0(%arg0: i32, %arg1: i32) -> (i32, i32) {
    %c0_i32 = arith.constant 0 : i32
    %c0_i32_0 = arith.constant 0 : i32
    return %arg0, %c0_i32 : i32, i32
  }
  func.func @transform_1(%arg0: i32, %arg1: i32) -> (i32, i32) {
    %c0_i32 = arith.constant 0 : i32
    %c0_i32_0 = arith.constant 0 : i32
    return %c0_i32, %arg1 : i32, i32
  }
  func.func @transform_2(%arg0: i32, %arg1: i32) -> (i32, i32) {
    %c0_i32 = arith.constant 0 : i32
    return %arg0, %arg1 : i32, i32
  }
}

</mosaic_0001>

<bundles_post_ra>
// kernel: vgae_forward.5
= control target key start
LH: loop header
LB: loop body
LE: loop exit
PB: predicated region body
PF: predicated region fallthrough
CT: control target
= control target key end

     0   :  { %s726_s9 = smov 0   ;;  %s784_s0 = inlined_call_operand.vmem [shape: bf16[256,128], index: 0, kind: input, shape index: {}]   ;;  %s785_s1 = inlined_call_operand.vmem [shape: bf16[128,128], index: 1, kind: input, shape index: {}]   ;;  %s786_s2 = inlined_call_operand.vmem [shape: bf16[256,128], index: 2, kind: output, shape index: {}]  }
   0x1 LB: > { %s509_s10 = sadd.s32 4294967295, %s709_s9   ;;  %p513_p0 = scmp.ge.s32.totalorder %s709_s9, 1  ;;  %s709_s9 = sphi %s726_s9, %s12_s9  }
   0x2   : > { %p113_p1 = scmp.lt.s32.totalorder %s709_s9, 3 }
   0x4   : > { %p114_p2 = pnand %p513_p0, %p113_p1 }
   0x5   : > { %v687_v0 = vld [vmem:[%s785_s1] sm:$0xff] (!%p114_p2)   ;;  %s514_s13 = sshll.u32 (!%p114_p2), %s509_s10, 4  ;;  %v688_v1 = vld [vmem:[%s785_s1 + $0x8] sm:$0xff] (!%p114_p2)   ;;  %v689_v2 = vld [vmem:[%s785_s1 + $0x10] sm:$0xff] (!%p114_p2)  }
   0x6   : > { %117 = sbr.rel (%p114_p2) target bundleno = 264 (0x108), region = 28  ;;  %p136_p3 = scmp.lt.s32.totalorder (!%p114_p2), %s514_s13, 31  ;;  %631 = vmatprep.subr.bf16.mxu0 (!%p114_p2), %v687_v0  ;;  %663 = vmatprep.subr.bf16.mxu1 (!%p114_p2), %v687_v0  ;;  %v690_v3 = vld [vmem:[%s785_s1 + $0x18] sm:$0xff] (!%p114_p2)   ;;  %v691_v6 = vld [vmem:[%s785_s1 + $0x20] sm:$0xff] (!%p114_p2)   ;;  %v692_v7 = vld [vmem:[%s785_s1 + $0x28] sm:$0xff] (!%p114_p2)  }
   0x7   : > { %632 = vmatpush3.bf16.msra.mxu0 (!%p114_p2), %v687_v0  ;;  %671 = vmatpush3.bf16.msra.mxu1 (!%p114_p2), %v687_v0  ;;  %v693_v8 = vld [vmem:[%s785_s1 + $0x30] sm:$0xff] (!%p114_p2)   ;;  %v694_v9 = vld [vmem:[%s785_s1 + $0x38] sm:$0xff] (!%p114_p2)  }
   0x8   : > { %633 = vmatprep.subr.bf16.mxu0 (!%p114_p2), %v688_v1  ;;  %664 = vmatprep.subr.bf16.mxu1 (!%p114_p2), %v688_v1 }
   0xb   : > { %634 = vmatpush3.bf16.msra.mxu0 (!%p114_p2), %v688_v1  ;;  %672 = vmatpush3.bf16.msra.mxu1 (!%p114_p2), %v688_v1 }
   0xc   : > { %635 = vmatprep.subr.bf16.mxu0 (!%p114_p2), %v689_v2  ;;  %665 = vmatprep.subr.bf16.mxu1 (!%p114_p2), %v689_v2 }
   0xd   : > { %s788_s13 = smov (!%p136_p3, %s514_s13), 31 }
   0xe   : > { %s515_s18 = sshll.u32 %s788_s13, 2 }
   0xf   : > { %s751_s21 = scalar_lea.vmem %s784_s0, %s515_s18  ;;  %636 = vmatpush3.bf16.msra.mxu0 %v689_v2  ;;  %673 = vmatpush3.bf16.msra.mxu1 %v689_v2  ;;  %s145_s6 = scalar_lea.vmem %s786_s2, %s515_s18 }
  0x10   : > { %v695_v4 = vld [vmem:[%s751_s21] sm:$0xff]   ;;  %637 = vmatprep.subr.bf16.mxu0 %v690_v3  ;;  %666 = vmatprep.subr.bf16.mxu1 %v690_v3  ;;  %v697_v10 = vld [vmem:[%s751_s21 + $0x8] sm:$0xff]   ;;  %v699_v12 = vld [vmem:[%s751_s21 + $0x10] sm:$0xff]  }
  0x11   : > { %v696_v5 = vld [vmem:[%s751_s21 + $0x20] sm:$0xff]   ;;  %647 = vmatprep.mubr.bf16.mxu0 %v695_v4  ;;  %v698_v11 = vld [vmem:[%s751_s21 + $0x28] sm:$0xff]   ;;  %v700_v13 = vld [vmem:[%s751_s21 + $0x30] sm:$0xff]  }
  0x12   : > { %655 = vmatprep.mubr.bf16.mxu1 %v696_v5  ;;  %v701_v14 = vld [vmem:[%s751_s21 + $0x18] sm:$0xff]  }
  0x13   : > { %638 = vmatpush3.bf16.msra.mxu0 %v690_v3  ;;  %674 = vmatpush3.bf16.msra.mxu1 %v690_v3  ;;  %v702_v15 = vld [vmem:[%s751_s21 + $0x38] sm:$0xff]  }
  0x14   : > { %639 = vmatprep.subr.bf16.mxu0 %v691_v6  ;;  %667 = vmatprep.subr.bf16.mxu1 %v691_v6 }
  0x17   : > { %640 = vmatpush3.bf16.msra.mxu0 %v691_v6  ;;  %675 = vmatpush3.bf16.msra.mxu1 %v691_v6 }
  0x18   : > { %641 = vmatprep.subr.bf16.mxu0 %v692_v7  ;;  %668 = vmatprep.subr.bf16.mxu1 %v692_v7 }
  0x1b   : > { %642 = vmatpush3.bf16.msra.mxu0 %v692_v7  ;;  %676 = vmatpush3.bf16.msra.mxu1 %v692_v7 }
  0x1c   : > { %643 = vmatprep.subr.bf16.mxu0 %v693_v8  ;;  %669 = vmatprep.subr.bf16.mxu1 %v693_v8 }
  0x1f   : > { %644 = vmatpush3.bf16.msra.mxu0 %v693_v8  ;;  %677 = vmatpush3.bf16.msra.mxu1 %v693_v8 }
  0x20   : > { %645 = vmatprep.subr.bf16.mxu0 %v694_v9  ;;  %670 = vmatprep.subr.bf16.mxu1 %v694_v9 }
  0x23   : > { %646 = vmatpush3.bf16.msra.mxu0 %v694_v9  ;;  %678 = vmatpush3.bf16.msra.mxu1 %v694_v9 }
  0x26   : > { %648 = vmatmul.mubr.bf16.vlgmr.msra.gmra.mrb[0].mxu0 %v697_v10  ;;  %656 = vmatmul.mubr.bf16.vlgmr.msra.gmra.mrb[0].mxu1 %v698_v11 }
  0x27   : > { %651 = vmatprep.mubr.bf16.mxu0 %v699_v12  ;;  %659 = vmatprep.mubr.bf16.mxu1 %v700_v13 }
  0x2e   : > { %652 = vmatmul.mubr.bf16.gmra.mrb[4].mxu0 %v701_v14  ;;  %660 = vmatmul.mubr.bf16.gmra.mrb[4].mxu1 %v702_v15 }
  0xf9   : > { %v649_v16 = vpop.f32.mrb[0].mxu0  ;;  %v657_v17 = vpop.f32.mrb[0].mxu1 }
  0xfa   : > { %v310_v18 = vpop.f32.mrb[1].mxu0  ;;  %v342_v19 = vpop.f32.mrb[1].mxu1 }
  0xfb   : > { %v650_v20 = vpop.f32.mrb[2].mxu0  ;;  %v658_v21 = vpop.f32.mrb[2].mxu1 }
  0xfc   : > { %v576_v22 = vpack.c.bf16 %v650_v20, %v649_v16  ;;  %v596_v23 = vpack.c.bf16 %v658_v21, %v657_v17  ;;  %v313_v24 = vpop.f32.mrb[3].mxu0  ;;  %v345_v25 = vpop.f32.mrb[3].mxu1 }
  0xfd   : > { %v571_v26 = vpack.c.bf16 %v313_v24, %v310_v18  ;;  %v591_v27 = vpack.c.bf16 %v345_v25, %v342_v19 }
  0xfe   : > { %608 = vst [vmem:[%s145_s6 + $0x8] sm:$0xff] %v576_v22   ;;  %612 = vst [vmem:[%s145_s6 + $0x28] sm:$0xff] %v596_v23  }
  0xff   : > { %572 = vst [vmem:[%s145_s6] sm:$0xff] %v571_v26   ;;  %611 = vst [vmem:[%s145_s6 + $0x20] sm:$0xff] %v591_v27  }
 0x101   : > { %v653_v28 = vpop.f32.mrb[4].mxu0  ;;  %v661_v29 = vpop.f32.mrb[4].mxu1 }
 0x102   : > { %v326_v30 = vpop.f32.mrb[5].mxu0  ;;  %v358_v31 = vpop.f32.mrb[5].mxu1 }
 0x103   : > { %v654_v32 = vpop.f32.mrb[6].mxu0  ;;  %v662_v33 = vpop.f32.mrb[6].mxu1 }
 0x104   : > { %v586_v34 = vpack.c.bf16 %v654_v32, %v653_v28  ;;  %v606_v35 = vpack.c.bf16 %v662_v33, %v661_v29  ;;  %v329_v36 = vpop.f32.mrb[7].mxu0  ;;  %v361_v37 = vpop.f32.mrb[7].mxu1 }
 0x105   : > { %v581_v38 = vpack.c.bf16 %v329_v36, %v326_v30  ;;  %v601_v39 = vpack.c.bf16 %v361_v37, %v358_v31 }
 0x106   : > { %610 = vst [vmem:[%s145_s6 + $0x18] sm:$0xff] %v586_v34   ;;  %614 = vst [vmem:[%s145_s6 + $0x38] sm:$0xff] %v606_v35  }
 0x107   : > { %609 = vst [vmem:[%s145_s6 + $0x10] sm:$0xff] %v581_v38   ;;  %613 = vst [vmem:[%s145_s6 + $0x30] sm:$0xff] %v601_v39  }
 0x108 PF: > { %s12_s9 = sadd.s32 1, %s709_s9  }
 0x109   : > { %p9_p4 = scmp.ge.s32.totalorder %s12_s9, 4  }
 0x10b   :  { %11 = sbr.rel (!%p9_p4) target bundleno = 1 (0x1), region = 58 }

// kernel: vgae_forward.6
= control target key start
LH: loop header
LB: loop body
LE: loop exit
PB: predicated region body
PF: predicated region fallthrough
CT: control target
= control target key end

     0   :  { %s1107_s9 = smov 0   ;;  %s1109_s10 = smov 0   ;;  %s1249_s0 = inlined_call_operand.vmem [shape: bf16[256,256], index: 0, kind: input, shape index: {}]   ;;  %s1250_s1 = inlined_call_operand.vmem [shape: bf16[256,128], index: 1, kind: input, shape index: {}]   ;;  %s1251_s2 = inlined_call_operand.vmem [shape: bf16[256,128], index: 2, kind: output, shape index: {}]  }
   0x1   :  { %s1111_s11 = smov 0   ;;  %s1113_s12 = smov 0  }
   0x2   :  { %s1115_s13 = smov 0   ;;  %s1117_s14 = smov 0  }
   0x3   :  { %s1119_s15 = smov 0  }
   0x4 LB: > { %s21_s16 = sadd.s32 1, %s1081_s13  ;;  %s24_s17 = sadd.s32 1, %s1085_s14  ;;  %s1089_s15 = sphi %s1119_s15, %s12_s15   ;;  %s1085_s14 = sphi %s1117_s14, %s1257_s14   ;;  %s1081_s13 = sphi %s1115_s13, %s1256_s13   ;;  %s1077_s12 = sphi %s1113_s12, %s1255_s12   ;;  %s1073_s11 = sphi %s1111_s11, %s1254_s11   ;;  %s1069_s10 = sphi %s1109_s10, %s1253_s10   ;;  %s1065_s9 = sphi %s1107_s9, %s1252_s9  }
   0x5   : > { %p22_p0 = scmp.ge.s32.totalorder %s21_s16, 2  ;;  %p40_p1 = scmp.ne.s32.totalorder %s1069_s10, %s1065_s9 }
   0x6   : > { %p41_p2 = scmp.eq.s32.totalorder %s1089_s15, 0  ;;  %s33_s21 = sadd.s32 1, %s1069_s10 }
   0x7   : > { %s1259_s16 = smov (%p22_p0, %s21_s16), 0  ;;  %s1261_s17 = smov (!%p22_p0, %s24_s17), %s1085_s14 }
   0x8   : > { %p42_p3 = por %p41_p2, %p40_p1  ;;  %p26_p4 = scmp.ge.s32.totalorder %s1261_s17, 2 }
   0x9   : > { %s29_s18 = ssub.s32 %s1081_s13, %s1259_s16  ;;  %p787_p6 = scmp.ge.s32.totalorder %s1089_s15, 4 }
   0xa   : > { %s1263_s17 = smov (%p26_p4, %s1261_s17), 0 }
   0xb   : > { %s28_s19 = ssub.s32 %s1085_s14, %s1263_s17  ;;  %118 = sbr.rel (%p787_p6) target bundleno = 34 (0x22), region = 16 }
   0xc   : > { %s30_s20 = sor.u32 %s29_s18, %s28_s19 }
   0xd   : > { %p31_p5 = scmp.eq.s32.totalorder %s30_s20, 0 }
   0xf   : > { %s1158_s22 = scalar_select %p31_p5, %s1069_s10, %s33_s21  }
  0x12   : > { %121 = sbr.rel (!%p42_p3) target bundleno = 34 (0x22), region = 20  ;;  %s123_s23 = sand.u32 (%p42_p3), 1, %s1069_s10  }
  0x13   : > { %s834_s24 = sshll.u32 (%p42_p3), %s1085_s14, 5  ;;  %s788_s25 = sshll.u32 (%p42_p3), %s123_s23, 6 }
  0x14   : > { %s128_s26 = sadd.s32 (%p42_p3), %s1081_s13, %s834_s24  ;;  %s125_s3 = scalar_lea.vmem (%p42_p3), [#allocation3], %s788_s25 }
  0x15   : > { %s791_s27 = sshll.u32 (%p42_p3), %s128_s26, 2 }
  0x16   : > { %s1167_s30 = scalar_lea.vmem (%p42_p3), %s1249_s0, %s791_s27 }
  0x17   : > { %v146_v0 = vld [vmem:[%s1167_s30] sm:$0xf] (%p42_p3)  ;;  %v148_v1 = vld [vmem:[%s1167_s30 + $0x8] sm:$0xf] (%p42_p3)  ;;  %v150_v2 = vld [vmem:[%s1167_s30 + $0x10] sm:$0xf] (%p42_p3) }
  0x18   : > { %147 = vst [vmem:[%s125_s3] sm:$0xf] (%p42_p3), %v146_v0  ;;  %149 = vst [vmem:[%s125_s3 + $0x4] sm:$0xf] (%p42_p3), %v148_v1  ;;  %v152_v3 = vld [vmem:[%s1167_s30 + $0x18] sm:$0xf] (%p42_p3) }
  0x19   : > { %151 = vst [vmem:[%s125_s3 + $0x8] sm:$0xf] %v150_v2  ;;  %v154_v4 = vld [vmem:[%s1167_s30 + $0x20] sm:$0xf]  ;;  %v156_v5 = vld [vmem:[%s1167_s30 + $0x28] sm:$0xf] }
  0x1a   : > { %153 = vst [vmem:[%s125_s3 + $0xc] sm:$0xf] %v152_v3  ;;  %155 = vst [vmem:[%s125_s3 + $0x10] sm:$0xf] %v154_v4  ;;  %v158_v6 = vld [vmem:[%s1167_s30 + $0x30] sm:$0xf] }
  0x1b   : > { %157 = vst [vmem:[%s125_s3 + $0x14] sm:$0xf] %v156_v5  ;;  %v160_v7 = vld [vmem:[%s1167_s30 + $0x38] sm:$0xf]  ;;  %v162_v8 = vld [vmem:[%s1167_s30 + $0x40] sm:$0xf] }
  0x1c   : > { %159 = vst [vmem:[%s125_s3 + $0x18] sm:$0xf] %v158_v6  ;;  %161 = vst [vmem:[%s125_s3 + $0x1c] sm:$0xf] %v160_v7  ;;  %v164_v9 = vld [vmem:[%s1167_s30 + $0x48] sm:$0xf] }
  0x1d   : > { %163 = vst [vmem:[%s125_s3 + $0x20] sm:$0xf] %v162_v8  ;;  %v166_v10 = vld [vmem:[%s1167_s30 + $0x50] sm:$0xf]  ;;  %v168_v11 = vld [vmem:[%s1167_s30 + $0x58] sm:$0xf] }
  0x1e   : > { %165 = vst [vmem:[%s125_s3 + $0x24] sm:$0xf] %v164_v9  ;;  %167 = vst [vmem:[%s125_s3 + $0x28] sm:$0xf] %v166_v10  ;;  %v170_v12 = vld [vmem:[%s1167_s30 + $0x60] sm:$0xf] }
  0x1f   : > { %169 = vst [vmem:[%s125_s3 + $0x2c] sm:$0xf] %v168_v11  ;;  %v172_v13 = vld [vmem:[%s1167_s30 + $0x68] sm:$0xf]  ;;  %v174_v14 = vld [vmem:[%s1167_s30 + $0x70] sm:$0xf] }
  0x20   : > { %171 = vst [vmem:[%s125_s3 + $0x30] sm:$0xf] %v170_v12  ;;  %173 = vst [vmem:[%s125_s3 + $0x34] sm:$0xf] %v172_v13  ;;  %v176_v15 = vld [vmem:[%s1167_s30 + $0x78] sm:$0xf] }
  0x21   : > { %175 = vst [vmem:[%s125_s3 + $0x38] sm:$0xf] %v174_v14  ;;  %177 = vst [vmem:[%s125_s3 + $0x3c] sm:$0xf] %v176_v15 }
  0x22 PF: > { %p792_p7 = scmp.ge.s32.totalorder %s1089_s15, 1  ;;  %p240_p8 = scmp.lt.s32.totalorder %s1089_s15, 5 }
  0x24   : > { %p241_p9 = pnand %p792_p7, %p240_p8 }
  0x25   : > { %s247_s4 = sand.u32 (!%p241_p9), 1, %s1065_s9   ;;  %s794_s5 = sshll.u32 (!%p241_p9), %s1073_s11, 4 }
  0x26   : > { %244 = sbr.rel (%p241_p9) target bundleno = 327 (0x147), region = 65  ;;  %s793_s6 = sshll.u32 (!%p241_p9), %s247_s4, 6 }
  0x27   : > { %p275_p10 = scmp.lt.s32.totalorder (!%p241_p9), %s794_s5, 31  ;;  %s796_s7 = sshll.u32 (!%p241_p9), %s1077_s12, 4 }
  0x28   : > { %p281_p11 = scmp.lt.s32.totalorder (!%p241_p9), %s796_s7, 31  ;;  %s1200_s9 = scalar_lea.vmem (!%p241_p9), [#allocation3], %s793_s6 }
  0x29   : > { %p798_p12 = scmp.ne.s32.totalorder (!%p241_p9), %s1073_s11, 0 }
  0x2d   : > { %s1265_s5 = smov (!%p275_p10, %s794_s5), 31  ;;  %s1267_s7 = smov (!%p281_p11, %s796_s7), 31 }
  0x2e   : > { %s795_s8 = sshll.u32 %s1265_s5, 2  ;;  %s797_s21 = sshll.u32 %s1267_s7, 2  ;;  %v1091_v16 = vmov (!%p798_p12), 0.0  }
  0x2f   : > { %s1193_s20 = scalar_lea.vmem %s1250_s1, %s795_s8  ;;  %s1198_s25 = scalar_lea.vmem %s1251_s2, %s797_s21  ;;  %291 = vst [vmem:[#allocation2] sm:$0xff] (!%p798_p12), %v1091_v16  ;;  %292 = vst [vmem:[#allocation2 + $0x8] sm:$0xff] (!%p798_p12), %v1091_v16 }
  0x30   : > { %290 = sbr.rel (%p798_p12) target bundleno = 55 (0x37), region = 73  ;;  %293 = vst [vmem:[#allocation2 + $0x10] sm:$0xff] (!%p798_p12), %v1091_v16  ;;  %294 = vst [vmem:[#allocation2 + $0x18] sm:$0xff] (!%p798_p12), %v1091_v16 }
  0x31   : > { %295 = vst [vmem:[#allocation2 + $0x20] sm:$0xff] (!%p798_p12), %v1091_v16  ;;  %296 = vst [vmem:[#allocation2 + $0x28] sm:$0xff] (!%p798_p12), %v1091_v16 }
  0x32   : > { %297 = vst [vmem:[#allocation2 + $0x30] sm:$0xff] (!%p798_p12), %v1091_v16  ;;  %298 = vst [vmem:[#allocation2 + $0x38] sm:$0xff] (!%p798_p12), %v1091_v16 }
  0x33   : > { %299 = vst [vmem:[#allocation2 + $0x40] sm:$0xff] (!%p798_p12), %v1091_v16  ;;  %300 = vst [vmem:[#allocation2 + $0x48] sm:$0xff] (!%p798_p12), %v1091_v16 }
  0x34   : > { %301 = vst [vmem:[#allocation2 + $0x50] sm:$0xff] (!%p798_p12), %v1091_v16  ;;  %302 = vst [vmem:[#allocation2 + $0x58] sm:$0xff] (!%p798_p12), %v1091_v16 }
  0x35   : > { %303 = vst [vmem:[#allocation2 + $0x60] sm:$0xff] (!%p798_p12), %v1091_v16  ;;  %304 = vst [vmem:[#allocation2 + $0x68] sm:$0xff] (!%p798_p12), %v1091_v16 }
  0x36   : > { %305 = vst [vmem:[#allocation2 + $0x70] sm:$0xff] (!%p798_p12), %v1091_v16  ;;  %306 = vst [vmem:[#allocation2 + $0x78] sm:$0xff] (!%p798_p12), %v1091_v16 }
  0x37 PF: > { %v1019_v17 = vld [vmem:[%s1193_s20] sm:$0xff]   ;;  %v1020_v18 = vld [vmem:[%s1193_s20 + $0x8] sm:$0xff]   ;;  %v1021_v19 = vld [vmem:[%s1193_s20 + $0x10] sm:$0xff]   ;;  %p815_p13 = scmp.ne.s32.totalorder %s1073_s11, 1 }
  0x38   : > { %914 = vmatprep.subr.bf16.mxu0 %v1019_v17  ;;  %946 = vmatprep.subr.bf16.mxu1 %v1019_v17  ;;  %v1022_v20 = vld [vmem:[%s1193_s20 + $0x18] sm:$0xff]   ;;  %v1027_v21 = vld [vmem:[%s1200_s9] sm:$0xff]   ;;  %v1024_v24 = vld [vmem:[%s1193_s20 + $0x28] sm:$0xff]  }
  0x39   : > { %915 = vmatpush3.bf16.msra.mxu0 %v1019_v17  ;;  %954 = vmatpush3.bf16.msra.mxu1 %v1019_v17  ;;  %v1028_v22 = vld [vmem:[%s1200_s9 + $0x20] sm:$0xff]   ;;  %v1025_v25 = vld [vmem:[%s1193_s20 + $0x30] sm:$0xff]   ;;  %v1026_v26 = vld [vmem:[%s1193_s20 + $0x38] sm:$0xff]  }
  0x3a   : > { %916 = vmatprep.subr.bf16.mxu0 %v1020_v18  ;;  %947 = vmatprep.subr.bf16.mxu1 %v1020_v18  ;;  %v1023_v23 = vld [vmem:[%s1193_s20 + $0x20] sm:$0xff]   ;;  %v1029_v27 = vld [vmem:[%s1200_s9 + $0x8] sm:$0xff]   ;;  %v1031_v29 = vld [vmem:[%s1200_s9 + $0x10] sm:$0xff]  }
  0x3b   : > { %930 = vmatprep.mubr.bf16.mxu0 %v1027_v21  ;;  %938 = vmatprep.mubr.bf16.mxu1 %v1028_v22  ;;  %v1030_v28 = vld [vmem:[%s1200_s9 + $0x28] sm:$0xff]   ;;  %v1032_v30 = vld [vmem:[%s1200_s9 + $0x30] sm:$0xff]   ;;  %v1033_v31 = vld [vmem:[%s1200_s9 + $0x18] sm:$0xff]  }
  0x3c   : > { %v1034_v32 = vld [vmem:[%s1200_s9 + $0x38] sm:$0xff]   ;;  %v309_v33 = vld [vmem:[#allocation2 + $0x10] sm:$0xff]  ;;  %v307_v35 = vld [vmem:[#allocation2] sm:$0xff] }
  0x3d   : > { %917 = vmatpush3.bf16.msra.mxu0 %v1020_v18  ;;  %955 = vmatpush3.bf16.msra.mxu1 %v1020_v18  ;;  %v317_v34 = vld [vmem:[#allocation2 + $0x50] sm:$0xff]  ;;  %v315_v36 = vld [vmem:[#allocation2 + $0x40] sm:$0xff]  ;;  %v310_v39 = vld [vmem:[#allocation2 + $0x18] sm:$0xff] }
  0x3e   : > { %918 = vmatprep.subr.bf16.mxu0 %v1021_v19  ;;  %948 = vmatprep.subr.bf16.mxu1 %v1021_v19  ;;  %v318_v40 = vld [vmem:[#allocation2 + $0x58] sm:$0xff]  ;;  %v308_v45 = vld [vmem:[#allocation2 + $0x8] sm:$0xff]  ;;  %v313_v57 = vld [vmem:[#allocation2 + $0x30] sm:$0xff] }
  0x3f   : > { %v316_v46 = vld [vmem:[#allocation2 + $0x48] sm:$0xff]  ;;  %v321_v58 = vld [vmem:[#allocation2 + $0x70] sm:$0xff]  ;;  %v311_v59 = vld [vmem:[#allocation2 + $0x20] sm:$0xff] }
  0x40   : > { %v319_v60 = vld [vmem:[#allocation2 + $0x60] sm:$0xff]  ;;  %v314_v63 = vld [vmem:[#allocation2 + $0x38] sm:$0xff]  ;;  %v312_v5 = vld [vmem:[#allocation2 + $0x28] sm:$0xff] }
  0x41   : > { %919 = vmatpush3.bf16.msra.mxu0 %v1021_v19  ;;  %956 = vmatpush3.bf16.msra.mxu1 %v1021_v19  ;;  %v322_v0 = vld [vmem:[#allocation2 + $0x78] sm:$0xff]  ;;  %v320_v6 = vld [vmem:[#allocation2 + $0x68] sm:$0xff] }
  0x42   : > { %920 = vmatprep.subr.bf16.mxu0 %v1022_v20  ;;  %949 = vmatprep.subr.bf16.mxu1 %v1022_v20 }
  0x45   : > { %921 = vmatpush3.bf16.msra.mxu0 %v1022_v20  ;;  %957 = vmatpush3.bf16.msra.mxu1 %v1022_v20 }
  0x46   : > { %922 = vmatprep.subr.bf16.mxu0 %v1023_v23  ;;  %950 = vmatprep.subr.bf16.mxu1 %v1023_v23 }
  0x49   : > { %923 = vmatpush3.bf16.msra.mxu0 %v1023_v23  ;;  %958 = vmatpush3.bf16.msra.mxu1 %v1023_v23 }
  0x4a   : > { %924 = vmatprep.subr.bf16.mxu0 %v1024_v24  ;;  %951 = vmatprep.subr.bf16.mxu1 %v1024_v24 }
  0x4d   : > { %925 = vmatpush3.bf16.msra.mxu0 %v1024_v24  ;;  %959 = vmatpush3.bf16.msra.mxu1 %v1024_v24 }
  0x4e   : > { %926 = vmatprep.subr.bf16.mxu0 %v1025_v25  ;;  %952 = vmatprep.subr.bf16.mxu1 %v1025_v25 }
  0x51   : > { %927 = vmatpush3.bf16.msra.mxu0 %v1025_v25  ;;  %960 = vmatpush3.bf16.msra.mxu1 %v1025_v25 }
  0x52   : > { %928 = vmatprep.subr.bf16.mxu0 %v1026_v26  ;;  %953 = vmatprep.subr.bf16.mxu1 %v1026_v26 }
  0x55   : > { %929 = vmatpush3.bf16.msra.mxu0 %v1026_v26  ;;  %961 = vmatpush3.bf16.msra.mxu1 %v1026_v26 }
  0x58   : > { %931 = vmatmul.mubr.bf16.vlgmr.msra.gmra.mrb[0].mxu0 %v1029_v27  ;;  %939 = vmatmul.mubr.bf16.vlgmr.msra.gmra.mrb[0].mxu1 %v1030_v28 }
  0x59   : > { %934 = vmatprep.mubr.bf16.mxu0 %v1031_v29  ;;  %942 = vmatprep.mubr.bf16.mxu1 %v1032_v30 }
  0x60   : > { %935 = vmatmul.mubr.bf16.gmra.mrb[4].mxu0 %v1033_v31  ;;  %943 = vmatmul.mubr.bf16.gmra.mrb[4].mxu1 %v1034_v32 }
 0x12b   : > { %v932_v37 = vpop.f32.mrb[0].mxu0  ;;  %v940_v38 = vpop.f32.mrb[0].mxu1 }
 0x12c   : > { %v550_v41 = vadd.f32 %v932_v37, %v309_v33  ;;  %v558_v42 = vadd.f32 %v940_v38, %v317_v34  ;;  %v485_v43 = vpop.f32.mrb[1].mxu0  ;;  %v517_v44 = vpop.f32.mrb[1].mxu1 }
 0x12d   : > { %v548_v47 = vadd.f32 %v485_v43, %v307_v35  ;;  %v556_v48 = vadd.f32 %v517_v44, %v315_v36  ;;  %v933_v49 = vpop.f32.mrb[2].mxu0  ;;  %v941_v50 = vpop.f32.mrb[2].mxu1 }
 0x12e   : > { %566 = vst [vmem:[#allocation2 + $0x10] sm:$0xff] %v550_v41  ;;  %574 = vst [vmem:[#allocation2 + $0x50] sm:$0xff] %v558_v42  ;;  %v551_v51 = vadd.f32 %v933_v49, %v310_v39  ;;  %v559_v52 = vadd.f32 %v941_v50, %v318_v40  ;;  %v488_v53 = vpop.f32.mrb[3].mxu0  ;;  %v520_v54 = vpop.f32.mrb[3].mxu1 }
 0x12f   : > { %564 = vst [vmem:[#allocation2] sm:$0xff] %v548_v47  ;;  %572 = vst [vmem:[#allocation2 + $0x40] sm:$0xff] %v556_v48  ;;  %v549_v55 = vadd.f32 %v488_v53, %v308_v45  ;;  %v557_v56 = vadd.f32 %v520_v54, %v316_v46 }
 0x130   : > { %567 = vst [vmem:[#allocation2 + $0x18] sm:$0xff] %v551_v51  ;;  %575 = vst [vmem:[#allocation2 + $0x58] sm:$0xff] %v559_v52 }
 0x131   : > { %565 = vst [vmem:[#allocation2 + $0x8] sm:$0xff] %v549_v55  ;;  %573 = vst [vmem:[#allocation2 + $0x48] sm:$0xff] %v557_v56 }
 0x133   : > { %v936_v61 = vpop.f32.mrb[4].mxu0  ;;  %v944_v62 = vpop.f32.mrb[4].mxu1  ;;  %583 = sbr.rel (%p815_p13) target bundleno = 327 (0x147), region = 77 }
 0x134   : > { %v554_v1 = vadd.f32 %v936_v61, %v313_v57  ;;  %v562_v2 = vadd.f32 %v944_v62, %v321_v58  ;;  %v501_v3 = vpop.f32.mrb[5].mxu0  ;;  %v533_v4 = vpop.f32.mrb[5].mxu1 }
 0x135   : > { %v552_v7 = vadd.f32 %v501_v3, %v311_v59  ;;  %v560_v8 = vadd.f32 %v533_v4, %v319_v60  ;;  %v937_v9 = vpop.f32.mrb[6].mxu0  ;;  %v945_v10 = vpop.f32.mrb[6].mxu1  ;;  %v586_v19 = vld [vmem:[#allocation2 + $0x10] sm:$0xff] (!%p815_p13) }
 0x136   : > { %570 = vst [vmem:[#allocation2 + $0x30] sm:$0xff] %v554_v1  ;;  %578 = vst [vmem:[#allocation2 + $0x70] sm:$0xff] %v562_v2  ;;  %v555_v11 = vadd.f32 %v937_v9, %v314_v63  ;;  %v563_v12 = vadd.f32 %v945_v10, %v322_v0  ;;  %v504_v13 = vpop.f32.mrb[7].mxu0  ;;  %v536_v14 = vpop.f32.mrb[7].mxu1  ;;  %v584_v17 = vld [vmem:[#allocation2] sm:$0xff] (!%p815_p13)  ;;  %v602_v23 = vmax.f32 (!%p815_p13), %v586_v19, 0.0 }
 0x137   : > { %568 = vst [vmem:[#allocation2 + $0x20] sm:$0xff] %v552_v7  ;;  %576 = vst [vmem:[#allocation2 + $0x60] sm:$0xff] %v560_v8  ;;  %v553_v15 = vadd.f32 %v504_v13, %v312_v5  ;;  %v561_v16 = vadd.f32 %v536_v14, %v320_v6  ;;  %v600_v20 = vmax.f32 (!%p815_p13), %v584_v17, 0.0  ;;  %v587_v22 = vld [vmem:[#allocation2 + $0x18] sm:$0xff] (!%p815_p13)  ;;  %v592_v31 = vld [vmem:[#allocation2 + $0x40] sm:$0xff] (!%p815_p13) }
 0x138   : > { %571 = vst [vmem:[#allocation2 + $0x38] sm:$0xff] %v555_v11  ;;  %579 = vst [vmem:[#allocation2 + $0x78] sm:$0xff] %v563_v12  ;;  %v585_v18 = vld [vmem:[#allocation2 + $0x8] sm:$0xff] (!%p815_p13)  ;;  %v603_v26 = vmax.f32 (!%p815_p13), %v587_v22, 0.0  ;;  %v608_v36 = vmax.f32 (!%p815_p13), %v592_v31, 0.0  ;;  %v594_v37 = vld [vmem:[#allocation2 + $0x50] sm:$0xff] (!%p815_p13) }
 0x139   : > { %569 = vst [vmem:[#allocation2 + $0x28] sm:$0xff] %v553_v15  ;;  %577 = vst [vmem:[#allocation2 + $0x68] sm:$0xff] %v561_v16  ;;  %v601_v21 = vmax.f32 (!%p815_p13), %v585_v18, 0.0  ;;  %v593_v35 = vld [vmem:[#allocation2 + $0x48] sm:$0xff] (!%p815_p13)  ;;  %v595_v38 = vld [vmem:[#allocation2 + $0x58] sm:$0xff] (!%p815_p13)  ;;  %v610_v42 = vmax.f32 (!%p815_p13), %v594_v37, 0.0 }
 0x13a   : > { %v859_v39 = vpack.c.bf16 %v603_v26, %v602_v23  ;;  %v609_v41 = vmax.f32 %v593_v35, 0.0  ;;  %v611_v47 = vmax.f32 %v595_v38, 0.0 }
 0x13b   : > { %v854_v32 = vpack.c.bf16 %v601_v21, %v600_v20 }
 0x13c   : > { %891 = vst [vmem:[%s1198_s25 + $0x8] sm:$0xff] %v859_v39   ;;  %v874_v51 = vpack.c.bf16 %v609_v41, %v608_v36  ;;  %v879_v54 = vpack.c.bf16 %v611_v47, %v610_v42 }
 0x13d   : > { %v590_v29 = vld [vmem:[#allocation2 + $0x30] sm:$0xff]  ;;  %855 = vst [vmem:[%s1198_s25] sm:$0xff] %v854_v32  }
 0x13e   : > { %v588_v24 = vld [vmem:[#allocation2 + $0x20] sm:$0xff]  ;;  %v606_v33 = vmax.f32 %v590_v29, 0.0  ;;  %v598_v45 = vld [vmem:[#allocation2 + $0x70] sm:$0xff]  ;;  %894 = vst [vmem:[%s1198_s25 + $0x20] sm:$0xff] %v874_v51   ;;  %895 = vst [vmem:[%s1198_s25 + $0x28] sm:$0xff] %v879_v54  }
 0x13f   : > { %v604_v27 = vmax.f32 %v588_v24, 0.0  ;;  %v591_v30 = vld [vmem:[#allocation2 + $0x38] sm:$0xff]  ;;  %v596_v43 = vld [vmem:[#allocation2 + $0x60] sm:$0xff]  ;;  %v614_v52 = vmax.f32 %v598_v45, 0.0 }
 0x140   : > { %v589_v25 = vld [vmem:[#allocation2 + $0x28] sm:$0xff]  ;;  %v607_v34 = vmax.f32 %v591_v30, 0.0  ;;  %v612_v48 = vmax.f32 %v596_v43, 0.0  ;;  %v599_v50 = vld [vmem:[#allocation2 + $0x78] sm:$0xff] }
 0x141   : > { %v605_v28 = vmax.f32 %v589_v25, 0.0  ;;  %v597_v44 = vld [vmem:[#allocation2 + $0x68] sm:$0xff]  ;;  %v615_v53 = vmax.f32 %v599_v50, 0.0 }
 0x142   : > { %v869_v46 = vpack.c.bf16 %v607_v34, %v606_v33  ;;  %v613_v49 = vmax.f32 %v597_v44, 0.0 }
 0x143   : > { %v864_v40 = vpack.c.bf16 %v605_v28, %v604_v27  ;;  %v889_v56 = vpack.c.bf16 %v615_v53, %v614_v52 }
 0x144   : > { %893 = vst [vmem:[%s1198_s25 + $0x18] sm:$0xff] %v869_v46   ;;  %v884_v55 = vpack.c.bf16 %v613_v49, %v612_v48 }
 0x145   : > { %892 = vst [vmem:[%s1198_s25 + $0x10] sm:$0xff] %v864_v40   ;;  %897 = vst [vmem:[%s1198_s25 + $0x38] sm:$0xff] %v889_v56  }
 0x146   : > { %896 = vst [vmem:[%s1198_s25 + $0x30] sm:$0xff] %v884_v55  }
 0x147 PF: > { %s12_s15 = sadd.s32 1, %s1089_s15   ;;  %s1252_s9 = smov %s1069_s10 }
 0x148   : > { %p9_p0 = scmp.ge.s32.totalorder %s12_s15, 6   ;;  %s1253_s10 = smov %s1158_s22 }
 0x149   : > { %s1254_s11 = smov %s1081_s13  ;;  %s1255_s12 = smov %s1085_s14 }
 0x14a   : > { %s1256_s13 = smov %s1259_s16  ;;  %s1257_s14 = smov %s1263_s17 }
 0x14b   :  { %11 = sbr.rel (!%p9_p0) target bundleno = 4 (0x4), region = 115 }

// kernel: vgae_forward.7
= control target key start
LH: loop header
LB: loop body
LE: loop exit
PB: predicated region body
PF: predicated region fallthrough
CT: control target
= control target key end

     0   :  { %s743_s9 = smov 0   ;;  %s848_s0 = inlined_call_operand.vmem [shape: bf16[256,128], index: 0, kind: input, shape index: {}]   ;;  %s849_s1 = inlined_call_operand.vmem [shape: bf16[128,256], index: 1, kind: input, shape index: {}]   ;;  %s850_s2 = inlined_call_operand.vmem [shape: bf16[256,256], index: 2, kind: output, shape index: {}]  }
   0x1 LB: > { %s593_s10 = sadd.s32 4294967295, %s725_s9   ;;  %p597_p0 = scmp.ge.s32.totalorder %s725_s9, 1  ;;  %s725_s9 = sphi %s743_s9, %s12_s9  }
   0x2   : > { %p113_p1 = scmp.lt.s32.totalorder %s725_s9, 3 }
   0x4   : > { %p114_p2 = pnand %p597_p0, %p113_p1 }
   0x5   : > { %v687_v0 = vld [vmem:[%s849_s1 + $0x4] ss:$8 sps:$4 sm:$0xff] (!%p114_p2)   ;;  %s598_s13 = sshll.u32 (!%p114_p2), %s593_s10, 4  ;;  %v689_v1 = vld [vmem:[%s849_s1] ss:$8 sps:$4 sm:$0xff] (!%p114_p2)   ;;  %v727_v2 = vmov (!%p114_p2), 0  }
   0x6   : > { %117 = sbr.rel (%p114_p2) target bundleno = 281 (0x119), region = 28  ;;  %342 = vmatprep.mubr.bf16.mxu0 (!%p114_p2), %v727_v2  ;;  %382 = vmatprep.mubr.bf16.mxu1 (!%p114_p2), %v727_v2  ;;  %p137_p3 = scmp.lt.s32.totalorder (!%p114_p2), %s598_s13, 31  ;;  %v690_v3 = vld [vmem:[%s849_s1 + $0x14] ss:$8 sps:$4 sm:$0xff] (!%p114_p2)   ;;  %v692_v4 = vld [vmem:[%s849_s1 + $0x10] ss:$8 sps:$4 sm:$0xff] (!%p114_p2)  }
   0x7   : > { %310 = vmatprep.subr.bf16.mxu0 (!%p114_p2), %v687_v0  ;;  %662 = vmatprep.subr.bf16.mxu1 (!%p114_p2), %v687_v0  ;;  %v693_v5 = vld [vmem:[%s849_s1 + $0x24] ss:$8 sps:$4 sm:$0xff] (!%p114_p2)   ;;  %v695_v6 = vld [vmem:[%s849_s1 + $0x20] ss:$8 sps:$4 sm:$0xff] (!%p114_p2)   ;;  %v696_v7 = vld [vmem:[%s849_s1 + $0x34] ss:$8 sps:$4 sm:$0xff] (!%p114_p2)  }
   0x8   : > { %311 = vmatpush1.bf16.msra.mxu0 (!%p114_p2), %v689_v1  ;;  %670 = vmatpush1.bf16.msra.mxu1 (!%p114_p2), %v689_v1  ;;  %v698_v8 = vld [vmem:[%s849_s1 + $0x30] ss:$8 sps:$4 sm:$0xff] (!%p114_p2)   ;;  %v699_v9 = vld [vmem:[%s849_s1 + $0x44] ss:$8 sps:$4 sm:$0xff] (!%p114_p2)   ;;  %v701_v10 = vld [vmem:[%s849_s1 + $0x40] ss:$8 sps:$4 sm:$0xff] (!%p114_p2)  }
   0x9   : > { %312 = vmatprep.subr.bf16.mxu0 (!%p114_p2), %v690_v3  ;;  %663 = vmatprep.subr.bf16.mxu1 (!%p114_p2), %v690_v3  ;;  %v702_v11 = vld [vmem:[%s849_s1 + $0x54] ss:$8 sps:$4 sm:$0xff] (!%p114_p2)   ;;  %v704_v12 = vld [vmem:[%s849_s1 + $0x50] ss:$8 sps:$4 sm:$0xff] (!%p114_p2)   ;;  %v705_v13 = vld [vmem:[%s849_s1 + $0x64] ss:$8 sps:$4 sm:$0xff] (!%p114_p2)  }
   0xa   : > { %v707_v14 = vld [vmem:[%s849_s1 + $0x60] ss:$8 sps:$4 sm:$0xff] (!%p114_p2)   ;;  %v708_v15 = vld [vmem:[%s849_s1 + $0x74] ss:$8 sps:$4 sm:$0xff] (!%p114_p2)   ;;  %v710_v16 = vld [vmem:[%s849_s1 + $0x70] ss:$8 sps:$4 sm:$0xff] (!%p114_p2)  }
   0xc   : > { %313 = vmatpush1.bf16.msra.mxu0 (!%p114_p2), %v692_v4  ;;  %671 = vmatpush1.bf16.msra.mxu1 (!%p114_p2), %v692_v4 }
   0xd   : > { %s852_s13 = smov (!%p137_p3, %s598_s13), 31  ;;  %314 = vmatprep.subr.bf16.mxu0 %v693_v5  ;;  %664 = vmatprep.subr.bf16.mxu1 %v693_v5 }
   0xe   : > { %s599_s22 = sshll.u32 %s852_s13, 2 }
   0xf   : > { %s780_s29 = scalar_lea.vmem %s848_s0, %s599_s22  ;;  %s645_s22 = sshll.u32 %s852_s13, 3 }
  0x10   : > { %315 = vmatpush1.bf16.msra.mxu0 %v695_v6  ;;  %672 = vmatpush1.bf16.msra.mxu1 %v695_v6  ;;  %v711_v17 = vld [vmem:[%s780_s29] sm:$0xff]   ;;  %v713_v19 = vld [vmem:[%s780_s29 + $0x8] sm:$0xff]   ;;  %v715_v21 = vld [vmem:[%s780_s29 + $0x10] sm:$0xff]   ;;  %s827_s25 = scalar_lea.vmem %s850_s2, %s645_s22 }
  0x11   : > { %316 = vmatprep.subr.bf16.mxu0 %v696_v7  ;;  %665 = vmatprep.subr.bf16.mxu1 %v696_v7  ;;  %v712_v18 = vld [vmem:[%s780_s29 + $0x20] sm:$0xff]   ;;  %v714_v20 = vld [vmem:[%s780_s29 + $0x28] sm:$0xff]   ;;  %v716_v22 = vld [vmem:[%s780_s29 + $0x30] sm:$0xff]  }
  0x12   : > { %v717_v23 = vld [vmem:[%s780_s29 + $0x18] sm:$0xff]  }
  0x13   : > { %v718_v24 = vld [vmem:[%s780_s29 + $0x38] sm:$0xff]  }
  0x14   : > { %317 = vmatpush1.bf16.msra.mxu0 %v698_v8  ;;  %673 = vmatpush1.bf16.msra.mxu1 %v698_v8 }
  0x15   : > { %318 = vmatprep.subr.bf16.mxu0 %v699_v9  ;;  %666 = vmatprep.subr.bf16.mxu1 %v699_v9 }
  0x18   : > { %319 = vmatpush1.bf16.msra.mxu0 %v701_v10  ;;  %674 = vmatpush1.bf16.msra.mxu1 %v701_v10 }
  0x19   : > { %320 = vmatprep.subr.bf16.mxu0 %v702_v11  ;;  %667 = vmatprep.subr.bf16.mxu1 %v702_v11 }
  0x1c   : > { %321 = vmatpush1.bf16.msra.mxu0 %v704_v12  ;;  %675 = vmatpush1.bf16.msra.mxu1 %v704_v12 }
  0x1d   : > { %322 = vmatprep.subr.bf16.mxu0 %v705_v13  ;;  %668 = vmatprep.subr.bf16.mxu1 %v705_v13 }
  0x20   : > { %323 = vmatpush1.bf16.msra.mxu0 %v707_v14  ;;  %676 = vmatpush1.bf16.msra.mxu1 %v707_v14 }
  0x21   : > { %324 = vmatprep.subr.bf16.mxu0 %v708_v15  ;;  %669 = vmatprep.subr.bf16.mxu1 %v708_v15 }
  0x24   : > { %325 = vmatpush1.bf16.msra.mxu0 %v710_v16  ;;  %677 = vmatpush1.bf16.msra.mxu1 %v710_v16 }
  0x27   : > { %343 = vmatmul.mubr.bf16.vlgmr.msra.gmra.mrb[0].mxu0 %v711_v17  ;;  %383 = vmatmul.mubr.bf16.vlgmr.msra.gmra.mrb[0].mxu1 %v712_v18 }
  0x28   : > { %352 = vmatprep.mubr.bf16.mxu0 %v727_v2  ;;  %392 = vmatprep.mubr.bf16.mxu1 %v727_v2 }
  0x2f   : > { %353 = vmatmul.mubr.bf16.gmra.mrb[4].mxu0 %v713_v19  ;;  %393 = vmatmul.mubr.bf16.gmra.mrb[4].mxu1 %v714_v20 }
  0x30   : > { %362 = vmatprep.mubr.bf16.mxu0 %v727_v2  ;;  %402 = vmatprep.mubr.bf16.mxu1 %v727_v2 }
  0x37   : > { %363 = vmatmul.mubr.bf16.gmra.mrb[8].mxu0 %v715_v21  ;;  %403 = vmatmul.mubr.bf16.gmra.mrb[8].mxu1 %v716_v22 }
  0x38   : > { %372 = vmatprep.mubr.bf16.mxu0 %v727_v2  ;;  %412 = vmatprep.mubr.bf16.mxu1 %v727_v2 }
  0x3f   : > { %373 = vmatmul.mubr.bf16.gmra.mrb[12].mxu0 %v717_v23  ;;  %413 = vmatmul.mubr.bf16.gmra.mrb[12].mxu1 %v718_v24 }
  0xfa   : > { %v344_v25 = vpop.f32.mrb[0].mxu0  ;;  %v384_v26 = vpop.f32.mrb[0].mxu1 }
  0xfb   : > { %v346_v27 = vpop.f32.mrb[1].mxu0  ;;  %v386_v28 = vpop.f32.mrb[1].mxu1 }
  0xfc   : > { %v646_v29 = vpack.c.bf16 %v346_v27, %v344_v25  ;;  %v654_v30 = vpack.c.bf16 %v386_v28, %v384_v26  ;;  %v348_v31 = vpop.f32.mrb[2].mxu0  ;;  %v388_v32 = vpop.f32.mrb[2].mxu1 }
  0xfd   : > { %v350_v33 = vpop.f32.mrb[3].mxu0  ;;  %v390_v34 = vpop.f32.mrb[3].mxu1 }
  0xfe   : > { %519 = vst [vmem:[%s827_s25] sm:$0xff] %v646_v29  ;;  %527 = vst [vmem:[%s827_s25 + $0x40] sm:$0xff] %v654_v30  ;;  %v647_v35 = vpack.c.bf16 %v350_v33, %v348_v31  ;;  %v655_v36 = vpack.c.bf16 %v390_v34, %v388_v32 }
 0x100   : > { %520 = vst [vmem:[%s827_s25 + $0x8] sm:$0xff] %v647_v35  ;;  %528 = vst [vmem:[%s827_s25 + $0x48] sm:$0xff] %v655_v36 }
 0x102   : > { %v354_v37 = vpop.f32.mrb[4].mxu0  ;;  %v394_v38 = vpop.f32.mrb[4].mxu1 }
 0x103   : > { %v356_v39 = vpop.f32.mrb[5].mxu0  ;;  %v396_v40 = vpop.f32.mrb[5].mxu1 }
 0x104   : > { %v648_v41 = vpack.c.bf16 %v356_v39, %v354_v37  ;;  %v656_v42 = vpack.c.bf16 %v396_v40, %v394_v38  ;;  %v358_v43 = vpop.f32.mrb[6].mxu0  ;;  %v398_v44 = vpop.f32.mrb[6].mxu1 }
 0x105   : > { %v360_v45 = vpop.f32.mrb[7].mxu0  ;;  %v400_v46 = vpop.f32.mrb[7].mxu1 }
 0x106   : > { %521 = vst [vmem:[%s827_s25 + $0x10] sm:$0xff] %v648_v41  ;;  %529 = vst [vmem:[%s827_s25 + $0x50] sm:$0xff] %v656_v42  ;;  %v649_v47 = vpack.c.bf16 %v360_v45, %v358_v43  ;;  %v657_v48 = vpack.c.bf16 %v400_v46, %v398_v44 }
 0x108   : > { %522 = vst [vmem:[%s827_s25 + $0x18] sm:$0xff] %v649_v47  ;;  %530 = vst [vmem:[%s827_s25 + $0x58] sm:$0xff] %v657_v48 }
 0x10a   : > { %v364_v49 = vpop.f32.mrb[8].mxu0  ;;  %v404_v50 = vpop.f32.mrb[8].mxu1 }
 0x10b   : > { %v366_v51 = vpop.f32.mrb[9].mxu0  ;;  %v406_v52 = vpop.f32.mrb[9].mxu1 }
 0x10c   : > { %v650_v53 = vpack.c.bf16 %v366_v51, %v364_v49  ;;  %v658_v54 = vpack.c.bf16 %v406_v52, %v404_v50  ;;  %v368_v55 = vpop.f32.mrb[10].mxu0  ;;  %v408_v56 = vpop.f32.mrb[10].mxu1 }
 0x10d   : > { %v370_v57 = vpop.f32.mrb[11].mxu0  ;;  %v410_v58 = vpop.f32.mrb[11].mxu1 }
 0x10e   : > { %523 = vst [vmem:[%s827_s25 + $0x20] sm:$0xff] %v650_v53  ;;  %531 = vst [vmem:[%s827_s25 + $0x60] sm:$0xff] %v658_v54  ;;  %v651_v59 = vpack.c.bf16 %v370_v57, %v368_v55  ;;  %v659_v60 = vpack.c.bf16 %v410_v58, %v408_v56 }
 0x110   : > { %524 = vst [vmem:[%s827_s25 + $0x28] sm:$0xff] %v651_v59  ;;  %532 = vst [vmem:[%s827_s25 + $0x68] sm:$0xff] %v659_v60 }
 0x112   : > { %v374_v61 = vpop.f32.mrb[12].mxu0  ;;  %v414_v62 = vpop.f32.mrb[12].mxu1 }
 0x113   : > { %v376_v63 = vpop.f32.mrb[13].mxu0  ;;  %v416_v0 = vpop.f32.mrb[13].mxu1 }
 0x114   : > { %v652_v1 = vpack.c.bf16 %v376_v63, %v374_v61  ;;  %v660_v2 = vpack.c.bf16 %v416_v0, %v414_v62  ;;  %v378_v3 = vpop.f32.mrb[14].mxu0  ;;  %v418_v4 = vpop.f32.mrb[14].mxu1 }
 0x115   : > { %v380_v5 = vpop.f32.mrb[15].mxu0  ;;  %v420_v6 = vpop.f32.mrb[15].mxu1 }
 0x116   : > { %525 = vst [vmem:[%s827_s25 + $0x30] sm:$0xff] %v652_v1  ;;  %533 = vst [vmem:[%s827_s25 + $0x70] sm:$0xff] %v660_v2  ;;  %v653_v7 = vpack.c.bf16 %v380_v5, %v378_v3  ;;  %v661_v8 = vpack.c.bf16 %v420_v6, %v418_v4 }
 0x118   : > { %526 = vst [vmem:[%s827_s25 + $0x38] sm:$0xff] %v653_v7  ;;  %534 = vst [vmem:[%s827_s25 + $0x78] sm:$0xff] %v661_v8 }
 0x119 PF: > { %s12_s9 = sadd.s32 1, %s725_s9  }
 0x11a   : > { %p9_p4 = scmp.ge.s32.totalorder %s12_s9, 4  }
 0x11c   :  { %11 = sbr.rel (!%p9_p4) target bundleno = 1 (0x1), region = 58 }

// kernel: vgae_forward.8
= control target key start
LH: loop header
LB: loop body
LE: loop exit
PB: predicated region body
PF: predicated region fallthrough
CT: control target
= control target key end

     0   :  { %s1480_s15 = smov 0   ;;  %s1482_s16 = smov 0   ;;  %s1680_s0 = inlined_call_operand.vmem [shape: bf16[256,256], index: 0, kind: input, shape index: {}]   ;;  %s1681_s1 = inlined_call_operand.vmem [shape: bf16[256,256], index: 1, kind: input, shape index: {}]   ;;  %s1682_s2 = inlined_call_operand.vmem [shape: f32[256,128], index: 2, kind: input, shape index: {}]   ;;  %s1683_s3 = inlined_call_operand.vmem [shape: f32[256,128], index: 3, kind: output, shape index: {0}]   ;;  %s1684_s4 = inlined_call_operand.vmem [shape: bf16[256,128], index: 4, kind: output, shape index: {1}]  }
   0x1   :  { %s1484_s17 = smov 0   ;;  %s1486_s18 = smov 0  }
   0x2   :  { %s1488_s19 = smov 0   ;;  %s1490_s20 = smov 0  }
   0x3   :  { %s1492_s21 = smov 0  }
   0x4 LB: > { %s24_s22 = sadd.s32 1, %s1443_s19  ;;  %s27_s23 = sadd.s32 1, %s1447_s20  ;;  %s1451_s21 = sphi %s1492_s21, %s15_s21   ;;  %s1447_s20 = sphi %s1490_s20, %s1690_s20   ;;  %s1443_s19 = sphi %s1488_s19, %s1689_s19   ;;  %s1439_s18 = sphi %s1486_s18, %s1688_s18   ;;  %s1435_s17 = sphi %s1484_s17, %s1687_s17   ;;  %s1431_s16 = sphi %s1482_s16, %s1686_s16   ;;  %s1427_s15 = sphi %s1480_s15, %s1685_s15  }
   0x5   : > { %p25_p0 = scmp.ge.s32.totalorder %s24_s22, 2  ;;  %p43_p1 = scmp.ne.s32.totalorder %s1431_s16, %s1427_s15 }
   0x6   : > { %p44_p2 = scmp.eq.s32.totalorder %s1451_s21, 0  ;;  %s36_s27 = sadd.s32 1, %s1431_s16 }
   0x7   : > { %s1692_s22 = smov (%p25_p0, %s24_s22), 0  ;;  %s1694_s23 = smov (!%p25_p0, %s27_s23), %s1447_s20 }
   0x8   : > { %p45_p3 = por %p44_p2, %p43_p1  ;;  %p29_p4 = scmp.ge.s32.totalorder %s1694_s23, 2 }
   0x9   : > { %s32_s24 = ssub.s32 %s1443_s19, %s1692_s22  ;;  %p1134_p6 = scmp.ge.s32.totalorder %s1451_s21, 4 }
   0xa   : > { %s1696_s23 = smov (%p29_p4, %s1694_s23), 0 }
   0xb   : > { %s31_s25 = ssub.s32 %s1447_s20, %s1696_s23  ;;  %173 = sbr.rel (%p1134_p6) target bundleno = 34 (0x22), region = 16 }
   0xc   : > { %s33_s26 = sor.u32 %s32_s24, %s31_s25 }
   0xd   : > { %p34_p5 = scmp.eq.s32.totalorder %s33_s26, 0 }
   0xf   : > { %s1531_s28 = scalar_select %p34_p5, %s1431_s16, %s36_s27  }
  0x12   : > { %176 = sbr.rel (!%p45_p3) target bundleno = 34 (0x22), region = 20  ;;  %s178_s29 = sand.u32 (%p45_p3), 1, %s1431_s16  }
  0x13   : > { %s1194_s30 = sshll.u32 (%p45_p3), %s1447_s20, 5  ;;  %s1135_s5 = sshll.u32 (%p45_p3), %s178_s29, 6 }
  0x14   : > { %s183_s6 = sadd.s32 (%p45_p3), %s1443_s19, %s1194_s30  ;;  %s180_s11 = scalar_lea.vmem (%p45_p3), [#allocation3], %s1135_s5 }
  0x15   : > { %s1138_s7 = sshll.u32 (%p45_p3), %s183_s6, 2 }
  0x16   : > { %s1540_s10 = scalar_lea.vmem (%p45_p3), %s1680_s0, %s1138_s7 }
  0x17   : > { %v201_v0 = vld [vmem:[%s1540_s10] sm:$0xf] (%p45_p3)  ;;  %v203_v1 = vld [vmem:[%s1540_s10 + $0x8] sm:$0xf] (%p45_p3)  ;;  %v205_v2 = vld [vmem:[%s1540_s10 + $0x10] sm:$0xf] (%p45_p3) }
  0x18   : > { %202 = vst [vmem:[%s180_s11] sm:$0xf] (%p45_p3), %v201_v0  ;;  %204 = vst [vmem:[%s180_s11 + $0x4] sm:$0xf] (%p45_p3), %v203_v1  ;;  %v207_v3 = vld [vmem:[%s1540_s10 + $0x18] sm:$0xf] (%p45_p3) }
  0x19   : > { %206 = vst [vmem:[%s180_s11 + $0x8] sm:$0xf] %v205_v2  ;;  %v209_v4 = vld [vmem:[%s1540_s10 + $0x20] sm:$0xf]  ;;  %v211_v5 = vld [vmem:[%s1540_s10 + $0x28] sm:$0xf] }
  0x1a   : > { %208 = vst [vmem:[%s180_s11 + $0xc] sm:$0xf] %v207_v3  ;;  %210 = vst [vmem:[%s180_s11 + $0x10] sm:$0xf] %v209_v4  ;;  %v213_v6 = vld [vmem:[%s1540_s10 + $0x30] sm:$0xf] }
  0x1b   : > { %212 = vst [vmem:[%s180_s11 + $0x14] sm:$0xf] %v211_v5  ;;  %v215_v7 = vld [vmem:[%s1540_s10 + $0x38] sm:$0xf]  ;;  %v217_v8 = vld [vmem:[%s1540_s10 + $0x40] sm:$0xf] }
  0x1c   : > { %214 = vst [vmem:[%s180_s11 + $0x18] sm:$0xf] %v213_v6  ;;  %216 = vst [vmem:[%s180_s11 + $0x1c] sm:$0xf] %v215_v7  ;;  %v219_v9 = vld [vmem:[%s1540_s10 + $0x48] sm:$0xf] }
  0x1d   : > { %218 = vst [vmem:[%s180_s11 + $0x20] sm:$0xf] %v217_v8  ;;  %v221_v10 = vld [vmem:[%s1540_s10 + $0x50] sm:$0xf]  ;;  %v223_v11 = vld [vmem:[%s1540_s10 + $0x58] sm:$0xf] }
  0x1e   : > { %220 = vst [vmem:[%s180_s11 + $0x24] sm:$0xf] %v219_v9  ;;  %222 = vst [vmem:[%s180_s11 + $0x28] sm:$0xf] %v221_v10  ;;  %v225_v12 = vld [vmem:[%s1540_s10 + $0x60] sm:$0xf] }
  0x1f   : > { %224 = vst [vmem:[%s180_s11 + $0x2c] sm:$0xf] %v223_v11  ;;  %v227_v13 = vld [vmem:[%s1540_s10 + $0x68] sm:$0xf]  ;;  %v229_v14 = vld [vmem:[%s1540_s10 + $0x70] sm:$0xf] }
  0x20   : > { %226 = vst [vmem:[%s180_s11 + $0x30] sm:$0xf] %v225_v12  ;;  %228 = vst [vmem:[%s180_s11 + $0x34] sm:$0xf] %v227_v13  ;;  %v231_v15 = vld [vmem:[%s1540_s10 + $0x78] sm:$0xf] }
  0x21   : > { %230 = vst [vmem:[%s180_s11 + $0x38] sm:$0xf] %v229_v14  ;;  %232 = vst [vmem:[%s180_s11 + $0x3c] sm:$0xf] %v231_v15 }
  0x22 PF: > { %p1139_p7 = scmp.ge.s32.totalorder %s1451_s21, 1  ;;  %p305_p8 = scmp.lt.s32.totalorder %s1451_s21, 5 }
  0x24   : > { %p306_p9 = pnand %p1139_p7, %p305_p8 }
  0x25   : > { %s312_s12 = sand.u32 (!%p306_p9), 1, %s1427_s15   ;;  %s1141_s13 = sshll.u32 (!%p306_p9), %s1435_s17, 4 }
  0x26   : > { %309 = sbr.rel (%p306_p9) target bundleno = 374 (0x176), region = 69  ;;  %s1140_s14 = sshll.u32 (!%p306_p9), %s312_s12, 6 }
  0x27   : > { %p355_p10 = scmp.lt.s32.totalorder (!%p306_p9), %s1141_s13, 31  ;;  %s1144_s24 = sshll.u32 (!%p306_p9), %s1439_s18, 4 }
  0x28   : > { %p362_p11 = scmp.lt.s32.totalorder (!%p306_p9), %s1144_s24, 31  ;;  %p1150_p12 = scmp.ne.s32.totalorder (!%p306_p9), %s1435_s17, 0 }
  0x2d   : > { %s1698_s13 = smov (!%p355_p10, %s1141_s13), 31  ;;  %s1700_s24 = smov (!%p362_p11, %s1144_s24), 31 }
  0x2e   : > { %s1195_s25 = sshll.u32 %s1698_s13, 3  ;;  %s1145_s30 = sshll.u32 %s1700_s24, 3  ;;  %v1453_v16 = vmov (!%p1150_p12), 0.0  }
  0x2f   : > { %s1566_s29 = scalar_lea.vmem %s1681_s1, %s1195_s25  ;;  %s1149_s5 = sshll.u32 %s1700_s24, 2  ;;  %384 = vst [vmem:[#allocation2] sm:$0xff] (!%p1150_p12), %v1453_v16  ;;  %385 = vst [vmem:[#allocation2 + $0x8] sm:$0xff] (!%p1150_p12), %v1453_v16 }
  0x30   : > { %s1571_s8 = scalar_lea.vmem %s1682_s2, %s1145_s30  ;;  %s1576_s18 = scalar_lea.vmem %s1683_s3, %s1145_s30  ;;  %386 = vst [vmem:[#allocation2 + $0x10] sm:$0xff] (!%p1150_p12), %v1453_v16  ;;  %387 = vst [vmem:[#allocation2 + $0x18] sm:$0xff] (!%p1150_p12), %v1453_v16 }
  0x31   : > { %s1581_s12 = scalar_lea.vmem %s1684_s4, %s1149_s5  ;;  %s1583_s13 = scalar_lea.vmem [#allocation3], %s1140_s14  ;;  %388 = vst [vmem:[#allocation2 + $0x20] sm:$0xff] (!%p1150_p12), %v1453_v16  ;;  %389 = vst [vmem:[#allocation2 + $0x28] sm:$0xff] (!%p1150_p12), %v1453_v16 }
  0x32   : > { %383 = sbr.rel (%p1150_p12) target bundleno = 63 (0x3f), region = 77  ;;  %390 = vst [vmem:[#allocation2 + $0x30] sm:$0xff] (!%p1150_p12), %v1453_v16  ;;  %391 = vst [vmem:[#allocation2 + $0x38] sm:$0xff] (!%p1150_p12), %v1453_v16 }
  0x33   : > { %392 = vst [vmem:[#allocation2 + $0x40] sm:$0xff] (!%p1150_p12), %v1453_v16  ;;  %393 = vst [vmem:[#allocation2 + $0x48] sm:$0xff] (!%p1150_p12), %v1453_v16 }
  0x34   : > { %394 = vst [vmem:[#allocation2 + $0x50] sm:$0xff] (!%p1150_p12), %v1453_v16  ;;  %395 = vst [vmem:[#allocation2 + $0x58] sm:$0xff] (!%p1150_p12), %v1453_v16 }
  0x35   : > { %396 = vst [vmem:[#allocation2 + $0x60] sm:$0xff] (!%p1150_p12), %v1453_v16  ;;  %397 = vst [vmem:[#allocation2 + $0x68] sm:$0xff] (!%p1150_p12), %v1453_v16 }
  0x36   : > { %398 = vst [vmem:[#allocation2 + $0x70] sm:$0xff] (!%p1150_p12), %v1453_v16  ;;  %399 = vst [vmem:[#allocation2 + $0x78] sm:$0xff] (!%p1150_p12), %v1453_v16 }
  0x37   : > { %400 = vst [vmem:[#allocation2 + $0x80] sm:$0xff] (!%p1150_p12), %v1453_v16  ;;  %401 = vst [vmem:[#allocation2 + $0x88] sm:$0xff] (!%p1150_p12), %v1453_v16 }
  0x38   : > { %402 = vst [vmem:[#allocation2 + $0x90] sm:$0xff] (!%p1150_p12), %v1453_v16  ;;  %403 = vst [vmem:[#allocation2 + $0x98] sm:$0xff] (!%p1150_p12), %v1453_v16 }
  0x39   : > { %404 = vst [vmem:[#allocation2 + $0xa0] sm:$0xff] %v1453_v16  ;;  %405 = vst [vmem:[#allocation2 + $0xa8] sm:$0xff] %v1453_v16 }
  0x3a   : > { %406 = vst [vmem:[#allocation2 + $0xb0] sm:$0xff] %v1453_v16  ;;  %407 = vst [vmem:[#allocation2 + $0xb8] sm:$0xff] %v1453_v16 }
  0x3b   : > { %408 = vst [vmem:[#allocation2 + $0xc0] sm:$0xff] %v1453_v16  ;;  %409 = vst [vmem:[#allocation2 + $0xc8] sm:$0xff] %v1453_v16 }
  0x3c   : > { %410 = vst [vmem:[#allocation2 + $0xd0] sm:$0xff] %v1453_v16  ;;  %411 = vst [vmem:[#allocation2 + $0xd8] sm:$0xff] %v1453_v16 }
  0x3d   : > { %412 = vst [vmem:[#allocation2 + $0xe0] sm:$0xff] %v1453_v16  ;;  %413 = vst [vmem:[#allocation2 + $0xe8] sm:$0xff] %v1453_v16 }
  0x3e   : > { %414 = vst [vmem:[#allocation2 + $0xf0] sm:$0xff] %v1453_v16  ;;  %415 = vst [vmem:[#allocation2 + $0xf8] sm:$0xff] %v1453_v16 }
  0x3f PF: > { %v1333_v17 = vld [vmem:[%s1566_s29 + $0x4] ss:$8 sps:$4 sm:$0xff]   ;;  %v1335_v18 = vld [vmem:[%s1566_s29] ss:$8 sps:$4 sm:$0xff]   ;;  %v1454_v19 = vmov 0   ;;  %v1361_v38 = vld [vmem:[%s1583_s13 + $0x10] sm:$0xff]  }
  0x40   : > { %640 = vmatprep.mubr.bf16.mxu0 %v1454_v19  ;;  %680 = vmatprep.mubr.bf16.mxu1 %v1454_v19  ;;  %v1336_v20 = vld [vmem:[%s1566_s29 + $0x14] ss:$8 sps:$4 sm:$0xff]   ;;  %v1338_v21 = vld [vmem:[%s1566_s29 + $0x10] ss:$8 sps:$4 sm:$0xff]   ;;  %v1339_v22 = vld [vmem:[%s1566_s29 + $0x24] ss:$8 sps:$4 sm:$0xff]  }
  0x41   : > { %608 = vmatprep.subr.bf16.mxu0 %v1333_v17  ;;  %1259 = vmatprep.subr.bf16.mxu1 %v1333_v17  ;;  %v1341_v23 = vld [vmem:[%s1566_s29 + $0x20] ss:$8 sps:$4 sm:$0xff]   ;;  %v1342_v24 = vld [vmem:[%s1566_s29 + $0x34] ss:$8 sps:$4 sm:$0xff]   ;;  %v1344_v25 = vld [vmem:[%s1566_s29 + $0x30] ss:$8 sps:$4 sm:$0xff]  }
  0x42   : > { %609 = vmatpush1.bf16.msra.mxu0 %v1335_v18  ;;  %1267 = vmatpush1.bf16.msra.mxu1 %v1335_v18  ;;  %v1345_v26 = vld [vmem:[%s1566_s29 + $0x44] ss:$8 sps:$4 sm:$0xff]   ;;  %v1347_v27 = vld [vmem:[%s1566_s29 + $0x40] ss:$8 sps:$4 sm:$0xff]   ;;  %v1348_v28 = vld [vmem:[%s1566_s29 + $0x54] ss:$8 sps:$4 sm:$0xff]  }
  0x43   : > { %610 = vmatprep.subr.bf16.mxu0 %v1336_v20  ;;  %1260 = vmatprep.subr.bf16.mxu1 %v1336_v20  ;;  %v1350_v29 = vld [vmem:[%s1566_s29 + $0x50] ss:$8 sps:$4 sm:$0xff]   ;;  %v1351_v30 = vld [vmem:[%s1566_s29 + $0x64] ss:$8 sps:$4 sm:$0xff]   ;;  %v1353_v31 = vld [vmem:[%s1566_s29 + $0x60] ss:$8 sps:$4 sm:$0xff]  }
  0x44   : > { %v1354_v32 = vld [vmem:[%s1566_s29 + $0x74] ss:$8 sps:$4 sm:$0xff]   ;;  %v1356_v33 = vld [vmem:[%s1566_s29 + $0x70] ss:$8 sps:$4 sm:$0xff]   ;;  %v1357_v34 = vld [vmem:[%s1583_s13] sm:$0xff]   ;;  %p1175_p13 = scmp.ne.s32.totalorder %s1435_s17, 1 }
  0x45   : > { %v1358_v35 = vld [vmem:[%s1583_s13 + $0x20] sm:$0xff]   ;;  %v1359_v36 = vld [vmem:[%s1583_s13 + $0x8] sm:$0xff]   ;;  %v1362_v39 = vld [vmem:[%s1583_s13 + $0x30] sm:$0xff]  }
  0x46   : > { %611 = vmatpush1.bf16.msra.mxu0 %v1338_v21  ;;  %1268 = vmatpush1.bf16.msra.mxu1 %v1338_v21  ;;  %v1360_v37 = vld [vmem:[%s1583_s13 + $0x28] sm:$0xff]   ;;  %v1363_v40 = vld [vmem:[%s1583_s13 + $0x18] sm:$0xff]   ;;  %v416_v42 = vld [vmem:[#allocation2] sm:$0xff] }
  0x47   : > { %612 = vmatprep.subr.bf16.mxu0 %v1339_v22  ;;  %1261 = vmatprep.subr.bf16.mxu1 %v1339_v22  ;;  %v1364_v41 = vld [vmem:[%s1583_s13 + $0x38] sm:$0xff]   ;;  %v432_v43 = vld [vmem:[#allocation2 + $0x80] sm:$0xff]  ;;  %v417_v44 = vld [vmem:[#allocation2 + $0x8] sm:$0xff] }
  0x48   : > { %v433_v45 = vld [vmem:[#allocation2 + $0x88] sm:$0xff]  ;;  %v418_v48 = vld [vmem:[#allocation2 + $0x10] sm:$0xff]  ;;  %v419_v54 = vld [vmem:[#allocation2 + $0x18] sm:$0xff] }
  0x49   : > { %v434_v49 = vld [vmem:[#allocation2 + $0x90] sm:$0xff]  ;;  %v435_v55 = vld [vmem:[#allocation2 + $0x98] sm:$0xff]  ;;  %v420_v2 = vld [vmem:[#allocation2 + $0x20] sm:$0xff] }
  0x4a   : > { %613 = vmatpush1.bf16.msra.mxu0 %v1341_v23  ;;  %1269 = vmatpush1.bf16.msra.mxu1 %v1341_v23  ;;  %v436_v3 = vld [vmem:[#allocation2 + $0xa0] sm:$0xff]  ;;  %v421_v4 = vld [vmem:[#allocation2 + $0x28] sm:$0xff]  ;;  %v422_v8 = vld [vmem:[#allocation2 + $0x30] sm:$0xff] }
  0x4b   : > { %614 = vmatprep.subr.bf16.mxu0 %v1342_v24  ;;  %1262 = vmatprep.subr.bf16.mxu1 %v1342_v24  ;;  %v437_v5 = vld [vmem:[#allocation2 + $0xa8] sm:$0xff]  ;;  %v438_v9 = vld [vmem:[#allocation2 + $0xb0] sm:$0xff]  ;;  %v423_v14 = vld [vmem:[#allocation2 + $0x38] sm:$0xff] }
  0x4c   : > { %v439_v15 = vld [vmem:[#allocation2 + $0xb8] sm:$0xff] }
  0x4e   : > { %615 = vmatpush1.bf16.msra.mxu0 %v1344_v25  ;;  %1270 = vmatpush1.bf16.msra.mxu1 %v1344_v25 }
  0x4f   : > { %616 = vmatprep.subr.bf16.mxu0 %v1345_v26  ;;  %1263 = vmatprep.subr.bf16.mxu1 %v1345_v26  ;;  %v424_v26 = vld [vmem:[#allocation2 + $0x40] sm:$0xff] }
  0x52   : > { %617 = vmatpush1.bf16.msra.mxu0 %v1347_v27  ;;  %1271 = vmatpush1.bf16.msra.mxu1 %v1347_v27  ;;  %v440_v27 = vld [vmem:[#allocation2 + $0xc0] sm:$0xff] }
  0x53   : > { %618 = vmatprep.subr.bf16.mxu0 %v1348_v28  ;;  %1264 = vmatprep.subr.bf16.mxu1 %v1348_v28  ;;  %v425_v28 = vld [vmem:[#allocation2 + $0x48] sm:$0xff] }
  0x56   : > { %619 = vmatpush1.bf16.msra.mxu0 %v1350_v29  ;;  %1272 = vmatpush1.bf16.msra.mxu1 %v1350_v29  ;;  %v441_v29 = vld [vmem:[#allocation2 + $0xc8] sm:$0xff] }
  0x57   : > { %620 = vmatprep.subr.bf16.mxu0 %v1351_v30  ;;  %1265 = vmatprep.subr.bf16.mxu1 %v1351_v30 }
  0x5a   : > { %621 = vmatpush1.bf16.msra.mxu0 %v1353_v31  ;;  %1273 = vmatpush1.bf16.msra.mxu1 %v1353_v31 }
  0x5b   : > { %622 = vmatprep.subr.bf16.mxu0 %v1354_v32  ;;  %1266 = vmatprep.subr.bf16.mxu1 %v1354_v32  ;;  %v426_v32 = vld [vmem:[#allocation2 + $0x50] sm:$0xff] }
  0x5e   : > { %623 = vmatpush1.bf16.msra.mxu0 %v1356_v33  ;;  %1274 = vmatpush1.bf16.msra.mxu1 %v1356_v33  ;;  %v442_v33 = vld [vmem:[#allocation2 + $0xd0] sm:$0xff] }
  0x61   : > { %641 = vmatmul.mubr.bf16.vlgmr.msra.gmra.mrb[0].mxu0 %v1357_v34  ;;  %681 = vmatmul.mubr.bf16.vlgmr.msra.gmra.mrb[0].mxu1 %v1358_v35 }
  0x62   : > { %650 = vmatprep.mubr.bf16.mxu0 %v1454_v19  ;;  %690 = vmatprep.mubr.bf16.mxu1 %v1454_v19 }
  0x69   : > { %651 = vmatmul.mubr.bf16.gmra.mrb[4].mxu0 %v1359_v36  ;;  %691 = vmatmul.mubr.bf16.gmra.mrb[4].mxu1 %v1360_v37 }
  0x6a   : > { %660 = vmatprep.mubr.bf16.mxu0 %v1454_v19  ;;  %700 = vmatprep.mubr.bf16.mxu1 %v1454_v19 }
  0x71   : > { %661 = vmatmul.mubr.bf16.gmra.mrb[8].mxu0 %v1361_v38  ;;  %701 = vmatmul.mubr.bf16.gmra.mrb[8].mxu1 %v1362_v39  ;;  %v427_v38 = vld [vmem:[#allocation2 + $0x58] sm:$0xff] }
  0x72   : > { %670 = vmatprep.mubr.bf16.mxu0 %v1454_v19  ;;  %710 = vmatprep.mubr.bf16.mxu1 %v1454_v19  ;;  %v443_v39 = vld [vmem:[#allocation2 + $0xd8] sm:$0xff] }
  0x79   : > { %671 = vmatmul.mubr.bf16.gmra.mrb[12].mxu0 %v1363_v40  ;;  %711 = vmatmul.mubr.bf16.gmra.mrb[12].mxu1 %v1364_v41 }
 0x134   : > { %v642_v46 = vpop.f32.mrb[0].mxu0  ;;  %v682_v47 = vpop.f32.mrb[0].mxu1 }
 0x135   : > { %v721_v50 = vadd.f32 %v642_v46, %v416_v42  ;;  %v737_v51 = vadd.f32 %v682_v47, %v432_v43  ;;  %v644_v52 = vpop.f32.mrb[1].mxu0  ;;  %v684_v53 = vpop.f32.mrb[1].mxu1 }
 0x136   : > { %v722_v56 = vadd.f32 %v644_v52, %v417_v44  ;;  %v738_v57 = vadd.f32 %v684_v53, %v433_v45  ;;  %v646_v58 = vpop.f32.mrb[2].mxu0  ;;  %v686_v59 = vpop.f32.mrb[2].mxu1  ;;  %v429_v52 = vld [vmem:[#allocation2 + $0x68] sm:$0xff] }
 0x137   : > { %753 = vst [vmem:[#allocation2] sm:$0xff] %v721_v50  ;;  %769 = vst [vmem:[#allocation2 + $0x80] sm:$0xff] %v737_v51  ;;  %v723_v60 = vadd.f32 %v646_v58, %v418_v48  ;;  %v739_v61 = vadd.f32 %v686_v59, %v434_v49  ;;  %v648_v62 = vpop.f32.mrb[3].mxu0  ;;  %v688_v63 = vpop.f32.mrb[3].mxu1  ;;  %v428_v50 = vld [vmem:[#allocation2 + $0x60] sm:$0xff]  ;;  %v445_v53 = vld [vmem:[#allocation2 + $0xe8] sm:$0xff] }
 0x138   : > { %754 = vst [vmem:[#allocation2 + $0x8] sm:$0xff] %v722_v56  ;;  %770 = vst [vmem:[#allocation2 + $0x88] sm:$0xff] %v738_v57  ;;  %v724_v0 = vadd.f32 %v648_v62, %v419_v54  ;;  %v740_v1 = vadd.f32 %v688_v63, %v435_v55  ;;  %v444_v51 = vld [vmem:[#allocation2 + $0xe0] sm:$0xff]  ;;  %v430_v56 = vld [vmem:[#allocation2 + $0x70] sm:$0xff] }
 0x139   : > { %755 = vst [vmem:[#allocation2 + $0x10] sm:$0xff] %v723_v60  ;;  %771 = vst [vmem:[#allocation2 + $0x90] sm:$0xff] %v739_v61  ;;  %v446_v57 = vld [vmem:[#allocation2 + $0xf0] sm:$0xff]  ;;  %v431_v62 = vld [vmem:[#allocation2 + $0x78] sm:$0xff] }
 0x13a   : > { %756 = vst [vmem:[#allocation2 + $0x18] sm:$0xff] %v724_v0  ;;  %772 = vst [vmem:[#allocation2 + $0x98] sm:$0xff] %v740_v1  ;;  %v447_v63 = vld [vmem:[#allocation2 + $0xf8] sm:$0xff] }
 0x13c   : > { %v652_v6 = vpop.f32.mrb[4].mxu0  ;;  %v692_v7 = vpop.f32.mrb[4].mxu1 }
 0x13d   : > { %v725_v10 = vadd.f32 %v652_v6, %v420_v2  ;;  %v741_v11 = vadd.f32 %v692_v7, %v436_v3  ;;  %v654_v12 = vpop.f32.mrb[5].mxu0  ;;  %v694_v13 = vpop.f32.mrb[5].mxu1 }
 0x13e   : > { %v726_v16 = vadd.f32 %v654_v12, %v421_v4  ;;  %v742_v17 = vadd.f32 %v694_v13, %v437_v5  ;;  %v656_v18 = vpop.f32.mrb[6].mxu0  ;;  %v696_v19 = vpop.f32.mrb[6].mxu1 }
 0x13f   : > { %757 = vst [vmem:[#allocation2 + $0x20] sm:$0xff] %v725_v10  ;;  %773 = vst [vmem:[#allocation2 + $0xa0] sm:$0xff] %v741_v11  ;;  %v727_v20 = vadd.f32 %v656_v18, %v422_v8  ;;  %v743_v21 = vadd.f32 %v696_v19, %v438_v9  ;;  %v658_v22 = vpop.f32.mrb[7].mxu0  ;;  %v698_v23 = vpop.f32.mrb[7].mxu1  ;;  %v790_v10 = vld [vmem:[#allocation2 + $0x8] sm:$0xff] (!%p1175_p13) }
 0x140   : > { %758 = vst [vmem:[#allocation2 + $0x28] sm:$0xff] %v726_v16  ;;  %774 = vst [vmem:[#allocation2 + $0xa8] sm:$0xff] %v742_v17  ;;  %v728_v24 = vadd.f32 %v658_v22, %v423_v14  ;;  %v744_v25 = vadd.f32 %v698_v23, %v439_v15  ;;  %v837_v11 = vmul.f32 (!%p1175_p13), 1.442695, %v790_v10  ;;  %v829_v10 = vld [vmem:[%s1571_s8 + $0x40] sm:$0xff] (!%p1175_p13) }
 0x141   : > { %759 = vst [vmem:[#allocation2 + $0x30] sm:$0xff] %v727_v20  ;;  %775 = vst [vmem:[#allocation2 + $0xb0] sm:$0xff] %v743_v21  ;;  %v792_v12 = vld [vmem:[#allocation2 + $0x18] sm:$0xff] (!%p1175_p13) }
 0x142   : > { %760 = vst [vmem:[#allocation2 + $0x38] sm:$0xff] %v728_v24  ;;  %776 = vst [vmem:[#allocation2 + $0xb8] sm:$0xff] %v744_v25  ;;  %v839_v13 = vmul.f32 (!%p1175_p13), 1.442695, %v792_v12  ;;  %1365 = vpow2.f32 (!%p1175_p13), %v837_v11 }
 0x144   : > { %v662_v30 = vpop.f32.mrb[8].mxu0  ;;  %v702_v31 = vpop.f32.mrb[8].mxu1  ;;  %1367 = vpow2.f32 (!%p1175_p13), %v839_v13 }
 0x145   : > { %v729_v34 = vadd.f32 %v662_v30, %v424_v26  ;;  %v745_v35 = vadd.f32 %v702_v31, %v440_v27  ;;  %v664_v36 = vpop.f32.mrb[9].mxu0  ;;  %v704_v37 = vpop.f32.mrb[9].mxu1  ;;  %v806_v26 = vld [vmem:[#allocation2 + $0x88] sm:$0xff] (!%p1175_p13)  ;;  %v821_v31 = vld [vmem:[%s1571_s8] sm:$0xff] (!%p1175_p13) }
 0x146   : > { %v730_v40 = vadd.f32 %v664_v36, %v425_v28  ;;  %v746_v41 = vadd.f32 %v704_v37, %v441_v29  ;;  %v666_v42 = vpop.f32.mrb[10].mxu0  ;;  %v706_v43 = vpop.f32.mrb[10].mxu1  ;;  %v853_v27 = vmul.f32 (!%p1175_p13), 1.442695, %v806_v26  ;;  %v808_v28 = vld [vmem:[#allocation2 + $0x98] sm:$0xff] (!%p1175_p13)  ;;  %v807_v26 = vld [vmem:[#allocation2 + $0x90] sm:$0xff] (!%p1175_p13) }
 0x147   : > { %761 = vst [vmem:[#allocation2 + $0x40] sm:$0xff] %v729_v34  ;;  %777 = vst [vmem:[#allocation2 + $0xc0] sm:$0xff] %v745_v35  ;;  %v731_v44 = vadd.f32 %v666_v42, %v426_v32  ;;  %v747_v45 = vadd.f32 %v706_v43, %v442_v33  ;;  %v668_v46 = vpop.f32.mrb[11].mxu0  ;;  %v708_v47 = vpop.f32.mrb[11].mxu1  ;;  %v794_v14 = vld [vmem:[#allocation2 + $0x28] sm:$0xff] (!%p1175_p13) }
 0x148   : > { %762 = vst [vmem:[#allocation2 + $0x48] sm:$0xff] %v730_v40  ;;  %778 = vst [vmem:[#allocation2 + $0xc8] sm:$0xff] %v746_v41  ;;  %v732_v48 = vadd.f32 %v668_v46, %v427_v38  ;;  %v748_v49 = vadd.f32 %v708_v47, %v443_v39  ;;  %v841_v15 = vmul.f32 (!%p1175_p13), 1.442695, %v794_v14  ;;  %v855_v29 = vmul.f32 (!%p1175_p13), 1.442695, %v808_v28 }
 0x149   : > { %763 = vst [vmem:[#allocation2 + $0x50] sm:$0xff] %v731_v44  ;;  %779 = vst [vmem:[#allocation2 + $0xd0] sm:$0xff] %v747_v45  ;;  %v796_v16 = vld [vmem:[#allocation2 + $0x38] sm:$0xff] (!%p1175_p13)  ;;  %v810_v30 = vld [vmem:[#allocation2 + $0xa8] sm:$0xff] (!%p1175_p13) }
 0x14a   : > { %764 = vst [vmem:[#allocation2 + $0x58] sm:$0xff] %v732_v48  ;;  %780 = vst [vmem:[#allocation2 + $0xd8] sm:$0xff] %v748_v49  ;;  %v843_v17 = vmul.f32 (!%p1175_p13), 1.442695, %v796_v16  ;;  %1369 = vpow2.f32 (!%p1175_p13), %v841_v15  ;;  %v857_v32 = vmul.f32 (!%p1175_p13), 1.442695, %v810_v30 }
 0x14b   : > { %v812_v33 = vld [vmem:[#allocation2 + $0xb8] sm:$0xff] (!%p1175_p13)  ;;  %v822_v34 = vld [vmem:[%s1571_s8 + $0x8] sm:$0xff] (!%p1175_p13)  ;;  %v789_v38 = vld [vmem:[#allocation2] sm:$0xff] (!%p1175_p13) }
 0x14c   : > { %v672_v54 = vpop.f32.mrb[12].mxu0  ;;  %v712_v55 = vpop.f32.mrb[12].mxu1  ;;  %788 = sbr.rel (%p1175_p13) target bundleno = 374 (0x176), region = 81  ;;  %1371 = vpow2.f32 (!%p1175_p13), %v843_v17  ;;  %v859_v35 = vmul.f32 (!%p1175_p13), 1.442695, %v812_v33  ;;  %v823_v39 = vld [vmem:[%s1571_s8 + $0x10] sm:$0xff] (!%p1175_p13) }
 0x14d   : > { %v733_v58 = vadd.f32 %v672_v54, %v428_v50  ;;  %v749_v59 = vadd.f32 %v712_v55, %v444_v51  ;;  %v674_v60 = vpop.f32.mrb[13].mxu0  ;;  %v714_v61 = vpop.f32.mrb[13].mxu1  ;;  %v791_v44 = vld [vmem:[#allocation2 + $0x10] sm:$0xff] (!%p1175_p13)  ;;  %v824_v45 = vld [vmem:[%s1571_s8 + $0x18] sm:$0xff] (!%p1175_p13)  ;;  %v793_v50 = vld [vmem:[#allocation2 + $0x20] sm:$0xff] (!%p1175_p13) }
 0x14e   : > { %v734_v0 = vadd.f32 %v674_v60, %v429_v52  ;;  %v750_v1 = vadd.f32 %v714_v61, %v445_v53  ;;  %v676_v2 = vpop.f32.mrb[14].mxu0  ;;  %v716_v3 = vpop.f32.mrb[14].mxu1  ;;  %v825_v51 = vld [vmem:[%s1571_s8 + $0x20] sm:$0xff] (!%p1175_p13)  ;;  %v830_v16 = vld [vmem:[%s1571_s8 + $0x48] sm:$0xff] (!%p1175_p13) }
 0x14f   : > { %765 = vst [vmem:[#allocation2 + $0x60] sm:$0xff] %v733_v58  ;;  %781 = vst [vmem:[#allocation2 + $0xe0] sm:$0xff] %v749_v59  ;;  %v735_v4 = vadd.f32 %v676_v2, %v430_v56  ;;  %v751_v5 = vadd.f32 %v716_v3, %v446_v57  ;;  %v678_v6 = vpop.f32.mrb[15].mxu0  ;;  %v718_v7 = vpop.f32.mrb[15].mxu1  ;;  %v798_v18 = vld [vmem:[#allocation2 + $0x48] sm:$0xff] (!%p1175_p13)  ;;  %v795_v57 = vld [vmem:[#allocation2 + $0x30] sm:$0xff] (!%p1175_p13) }
 0x150   : > { %766 = vst [vmem:[#allocation2 + $0x68] sm:$0xff] %v734_v0  ;;  %782 = vst [vmem:[#allocation2 + $0xe8] sm:$0xff] %v750_v1  ;;  %v736_v8 = vadd.f32 %v678_v6, %v431_v62  ;;  %v752_v9 = vadd.f32 %v718_v7, %v447_v63  ;;  %v845_v19 = vmul.f32 (!%p1175_p13), 1.442695, %v798_v18  ;;  %v814_v36 = vld [vmem:[#allocation2 + $0xc8] sm:$0xff] (!%p1175_p13)  ;;  %v1366_v37 = vpop.eup (!%p1175_p13), %1365  ;;  %v797_v63 = vld [vmem:[#allocation2 + $0x40] sm:$0xff] (!%p1175_p13) }
 0x151   : > { %767 = vst [vmem:[#allocation2 + $0x70] sm:$0xff] %v735_v4  ;;  %783 = vst [vmem:[#allocation2 + $0xf0] sm:$0xff] %v751_v5  ;;  %v800_v20 = vld [vmem:[#allocation2 + $0x58] sm:$0xff] (!%p1175_p13)  ;;  %v861_v40 = vmul.f32 (!%p1175_p13), 1.442695, %v814_v36  ;;  %v1368_v42 = vpop.eup (!%p1175_p13), %1367  ;;  %v869_v43 = vmul.f32 (!%p1175_p13), %v1366_v37, %v821_v31  ;;  %v826_v58 = vld [vmem:[%s1571_s8 + $0x28] sm:$0xff] (!%p1175_p13) }
 0x152   : > { %768 = vst [vmem:[#allocation2 + $0x78] sm:$0xff] %v736_v8  ;;  %784 = vst [vmem:[#allocation2 + $0xf8] sm:$0xff] %v752_v9  ;;  %v847_v21 = vmul.f32 (!%p1175_p13), 1.442695, %v800_v20  ;;  %1373 = vpow2.f32 (!%p1175_p13), %v845_v19  ;;  %v816_v41 = vld [vmem:[#allocation2 + $0xd8] sm:$0xff] (!%p1175_p13)  ;;  %v870_v49 = vmul.f32 (!%p1175_p13), %v1368_v42, %v822_v34  ;;  %v827_v0 = vld [vmem:[%s1571_s8 + $0x30] sm:$0xff] (!%p1175_p13) }
 0x153   : > { %v863_v46 = vmul.f32 1.442695, %v816_v41  ;;  %v885_v55 = vadd.f32 %v869_v43, %v789_v38  ;;  %v799_v4 = vld [vmem:[#allocation2 + $0x50] sm:$0xff]  ;;  %v828_v5 = vld [vmem:[%s1571_s8 + $0x38] sm:$0xff]  ;;  %v805_v20 = vld [vmem:[#allocation2 + $0x80] sm:$0xff] }
 0x154   : > { %1375 = vpow2.f32 %v847_v21  ;;  %v1370_v48 = vpop.eup %1369  ;;  %v886_v61 = vadd.f32 %v870_v49, %v791_v44  ;;  %v831_v21 = vld [vmem:[%s1571_s8 + $0x50] sm:$0xff]  ;;  %v809_v31 = vld [vmem:[#allocation2 + $0xa0] sm:$0xff]  ;;  %v834_v38 = vld [vmem:[%s1571_s8 + $0x68] sm:$0xff] }
 0x155   : > { %v871_v56 = vmul.f32 %v1370_v48, %v823_v39  ;;  %901 = vst [vmem:[%s1576_s18] sm:$0xff] %v885_v55  ;;  %v811_v37 = vld [vmem:[#allocation2 + $0xb0] sm:$0xff]  ;;  %v813_v42 = vld [vmem:[#allocation2 + $0xc0] sm:$0xff]  ;;  %v836_v49 = vld [vmem:[%s1571_s8 + $0x78] sm:$0xff] }
 0x156   : > { %v1372_v54 = vpop.eup %1371  ;;  %902 = vst [vmem:[%s1576_s18 + $0x8] sm:$0xff] %v886_v61  ;;  %v801_v9 = vld [vmem:[#allocation2 + $0x60] sm:$0xff]  ;;  %v1215_v11 = vpack.c.bf16 %v886_v61, %v885_v55  ;;  %v835_v43 = vld [vmem:[%s1571_s8 + $0x70] sm:$0xff] }
 0x157   : > { %v802_v22 = vld [vmem:[#allocation2 + $0x68] sm:$0xff]  ;;  %v872_v62 = vmul.f32 %v1372_v54, %v824_v45  ;;  %v887_v2 = vadd.f32 %v871_v56, %v793_v50  ;;  %v815_v48 = vld [vmem:[#allocation2 + $0xd0] sm:$0xff] }
 0x158   : > { %v849_v23 = vmul.f32 1.442695, %v802_v22  ;;  %v818_v47 = vld [vmem:[#allocation2 + $0xe8] sm:$0xff]  ;;  %v803_v15 = vld [vmem:[#allocation2 + $0x70] sm:$0xff]  ;;  %1216 = vst [vmem:[%s1581_s12] sm:$0xff] %v1215_v11  }
 0x159   : > { %v804_v24 = vld [vmem:[#allocation2 + $0x78] sm:$0xff]  ;;  %v865_v52 = vmul.f32 1.442695, %v818_v47  ;;  %v888_v7 = vadd.f32 %v872_v62, %v795_v57  ;;  %903 = vst [vmem:[%s1576_s18 + $0x10] sm:$0xff] %v887_v2 }
 0x15a   : > { %v851_v25 = vmul.f32 1.442695, %v804_v24  ;;  %1377 = vpow2.f32 %v849_v23  ;;  %v820_v53 = vld [vmem:[#allocation2 + $0xf8] sm:$0xff] }
 0x15b   : > { %v867_v59 = vmul.f32 1.442695, %v820_v53  ;;  %904 = vst [vmem:[%s1576_s18 + $0x18] sm:$0xff] %v888_v7  ;;  %v1220_v22 = vpack.c.bf16 %v888_v7, %v887_v2  ;;  %v817_v53 = vld [vmem:[#allocation2 + $0xe0] sm:$0xff] }
 0x15c   : > { %1379 = vpow2.f32 %v851_v25  ;;  %v1374_v60 = vpop.eup %1373 }
 0x15d   : > { %1381 = vpow2.f32 %v853_v27  ;;  %v873_v3 = vmul.f32 %v1374_v60, %v825_v51  ;;  %v832_v27 = vld [vmem:[%s1571_s8 + $0x58] sm:$0xff]  ;;  %1252 = vst [vmem:[%s1581_s12 + $0x8] sm:$0xff] %v1220_v22  }
 0x15e   : > { %1383 = vpow2.f32 %v855_v29  ;;  %v1376_v1 = vpop.eup %1375 }
 0x15f   : > { %1385 = vpow2.f32 %v857_v32  ;;  %v874_v8 = vmul.f32 %v1376_v1, %v826_v58  ;;  %v889_v13 = vadd.f32 %v873_v3, %v797_v63  ;;  %v833_v32 = vld [vmem:[%s1571_s8 + $0x60] sm:$0xff]  ;;  %v819_v58 = vld [vmem:[#allocation2 + $0xf0] sm:$0xff] }
 0x160   : > { %1387 = vpow2.f32 %v859_v35 }
 0x161   : > { %1389 = vpow2.f32 %v861_v40  ;;  %v890_v18 = vadd.f32 %v874_v8, %v799_v4  ;;  %905 = vst [vmem:[%s1576_s18 + $0x20] sm:$0xff] %v889_v13 }
 0x162   : > { %1391 = vpow2.f32 %v863_v46 }
 0x163   : > { %1393 = vpow2.f32 %v865_v52  ;;  %906 = vst [vmem:[%s1576_s18 + $0x28] sm:$0xff] %v890_v18  ;;  %v1225_v33 = vpack.c.bf16 %v890_v18, %v889_v13 }
 0x164   : > { %1395 = vpow2.f32 %v867_v59  ;;  %v1378_v6 = vpop.eup %1377 }
 0x165   : > { %v875_v14 = vmul.f32 %v1378_v6, %v827_v0  ;;  %1253 = vst [vmem:[%s1581_s12 + $0x10] sm:$0xff] %v1225_v33  }
 0x166   : > { %v1380_v12 = vpop.eup %1379 }
 0x167   : > { %v1382_v17 = vpop.eup %1381  ;;  %v876_v19 = vmul.f32 %v1380_v12, %v828_v5  ;;  %v891_v24 = vadd.f32 %v875_v14, %v801_v9 }
 0x168   : > { %v1384_v23 = vpop.eup %1383  ;;  %v877_v25 = vmul.f32 %v1382_v17, %v829_v10 }
 0x169   : > { %v1386_v28 = vpop.eup %1385  ;;  %v892_v29 = vadd.f32 %v876_v19, %v803_v15  ;;  %v878_v30 = vmul.f32 %v1384_v23, %v830_v16  ;;  %907 = vst [vmem:[%s1576_s18 + $0x30] sm:$0xff] %v891_v24 }
 0x16a   : > { %v1388_v34 = vpop.eup %1387  ;;  %v893_v35 = vadd.f32 %v877_v25, %v805_v20  ;;  %v879_v36 = vmul.f32 %v1386_v28, %v831_v21 }
 0x16b   : > { %v1390_v39 = vpop.eup %1389  ;;  %908 = vst [vmem:[%s1576_s18 + $0x38] sm:$0xff] %v892_v29  ;;  %v894_v40 = vadd.f32 %v878_v30, %v807_v26  ;;  %v880_v41 = vmul.f32 %v1388_v34, %v832_v27  ;;  %v1230_v44 = vpack.c.bf16 %v892_v29, %v891_v24 }
 0x16c   : > { %v1392_v45 = vpop.eup %1391  ;;  %909 = vst [vmem:[%s1576_s18 + $0x40] sm:$0xff] %v893_v35  ;;  %v895_v46 = vadd.f32 %v879_v36, %v809_v31  ;;  %v881_v47 = vmul.f32 %v1390_v39, %v833_v32 }
 0x16d   : > { %v1394_v50 = vpop.eup %1393  ;;  %910 = vst [vmem:[%s1576_s18 + $0x48] sm:$0xff] %v894_v40  ;;  %v896_v51 = vadd.f32 %v880_v41, %v811_v37  ;;  %v882_v52 = vmul.f32 %v1392_v45, %v834_v38  ;;  %1254 = vst [vmem:[%s1581_s12 + $0x18] sm:$0xff] %v1230_v44   ;;  %v1235_v54 = vpack.c.bf16 %v894_v40, %v893_v35 }
 0x16e   : > { %v1396_v55 = vpop.eup %1395  ;;  %911 = vst [vmem:[%s1576_s18 + $0x50] sm:$0xff] %v895_v46  ;;  %v897_v56 = vadd.f32 %v881_v47, %v813_v42  ;;  %v883_v57 = vmul.f32 %v1394_v50, %v835_v43 }
 0x16f   : > { %912 = vst [vmem:[%s1576_s18 + $0x58] sm:$0xff] %v896_v51  ;;  %v898_v59 = vadd.f32 %v882_v52, %v815_v48  ;;  %v884_v60 = vmul.f32 %v1396_v55, %v836_v49  ;;  %1255 = vst [vmem:[%s1581_s12 + $0x20] sm:$0xff] %v1235_v54   ;;  %v1240_v61 = vpack.c.bf16 %v896_v51, %v895_v46 }
 0x170   : > { %913 = vst [vmem:[%s1576_s18 + $0x60] sm:$0xff] %v897_v56  ;;  %v899_v62 = vadd.f32 %v883_v57, %v817_v53 }
 0x171   : > { %914 = vst [vmem:[%s1576_s18 + $0x68] sm:$0xff] %v898_v59  ;;  %v900_v63 = vadd.f32 %v884_v60, %v819_v58  ;;  %1256 = vst [vmem:[%s1581_s12 + $0x28] sm:$0xff] %v1240_v61   ;;  %v1245_v0 = vpack.c.bf16 %v898_v59, %v897_v56 }
 0x172   : > { %915 = vst [vmem:[%s1576_s18 + $0x70] sm:$0xff] %v899_v62 }
 0x173   : > { %916 = vst [vmem:[%s1576_s18 + $0x78] sm:$0xff] %v900_v63  ;;  %1257 = vst [vmem:[%s1581_s12 + $0x30] sm:$0xff] %v1245_v0   ;;  %v1250_v1 = vpack.c.bf16 %v900_v63, %v899_v62 }
 0x175   : > { %1258 = vst [vmem:[%s1581_s12 + $0x38] sm:$0xff] %v1250_v1  }
 0x176 PF: > { %s15_s21 = sadd.s32 1, %s1451_s21   ;;  %s1685_s15 = smov %s1431_s16 }
 0x177   : > { %p12_p0 = scmp.ge.s32.totalorder %s15_s21, 6   ;;  %s1686_s16 = smov %s1531_s28 }
 0x178   : > { %s1687_s17 = smov %s1443_s19  ;;  %s1688_s18 = smov %s1447_s20 }
 0x179   : > { %s1689_s19 = smov %s1692_s22  ;;  %s1690_s20 = smov %s1696_s23 }
 0x17a   :  { %14 = sbr.rel (!%p12_p0) target bundleno = 4 (0x4), region = 134 }

// kernel: vgae_forward.9
= control target key start
LH: loop header
LB: loop body
LE: loop exit
PB: predicated region body
PF: predicated region fallthrough
CT: control target
= control target key end

     0   :  { %s1303_s9 = smov 0   ;;  %s1305_s10 = smov 0   ;;  %s1489_s0 = inlined_call_operand.vmem [shape: bf16[256,128], index: 0, kind: input, shape index: {}]   ;;  %s1490_s1 = inlined_call_operand.vmem [shape: bf16[128,256], index: 1, kind: input, shape index: {}]   ;;  %s1491_s2 = inlined_call_operand.vmem [shape: bf16[256,256], index: 2, kind: output, shape index: {}]  }
   0x1   :  { %s1307_s11 = smov 0   ;;  %s1309_s12 = smov 0  }
   0x2   :  { %s1311_s13 = smov 0   ;;  %s1313_s14 = smov 0  }
   0x3   :  { %s1315_s15 = smov 0   ;;  %s1317_s16 = smov 0  }
   0x4   :  { %s1319_s17 = smov 0  }
   0x5 LB: > { %s871_s18 = sadd.s32 4294967295, %s1286_s17   ;;  %s21_s19 = sadd.s32 1, %s1278_s15  ;;  %s1286_s17 = sphi %s1319_s17, %s12_s17   ;;  %s1282_s16 = sphi %s1317_s16, %s1500_s16   ;;  %s1278_s15 = sphi %s1315_s15, %s1499_s15   ;;  %s1274_s14 = sphi %s1313_s14, %s1498_s14   ;;  %s1270_s13 = sphi %s1311_s13, %s1497_s13   ;;  %s1266_s12 = sphi %s1309_s12, %s1496_s12   ;;  %s1262_s11 = sphi %s1307_s11, %s1495_s11   ;;  %s1258_s10 = sphi %s1305_s10, %s1494_s10   ;;  %s1254_s9 = sphi %s1303_s9, %s1493_s9  }
   0x6   : > { %p22_p0 = scmp.ge.s32.totalorder %s21_s19, 2  ;;  %s24_s20 = sadd.s32 1, %s1282_s16 }
   0x7   : > { %s57_s21 = sadd.s32 1, %s1266_s12  ;;  %p64_p1 = scmp.ne.s32.totalorder %s1266_s12, %s1262_s11 }
   0x8   : > { %s1502_s19 = smov (%p22_p0, %s21_s19), 0  ;;  %s1504_s20 = smov (!%p22_p0, %s24_s20), %s1282_s16 }
   0x9   : > { %s54_s22 = ssub.s32 %s1278_s15, %s1502_s19  ;;  %p65_p2 = scmp.eq.s32.totalorder %s1286_s17, 0 }
   0xa   : > { %p26_p3 = scmp.ge.s32.totalorder %s1504_s20, 2  ;;  %p55_p4 = scmp.eq.s32.totalorder %s54_s22, 0 }
   0xb   : > { %p66_p5 = por %p65_p2, %p64_p1  ;;  %s85_s23 = sadd.s32 1, %s1258_s10 }
   0xc   : > { %s1506_s20 = smov (%p26_p3, %s1504_s20), 0  ;;  %p95_p6 = scmp.ne.s32.totalorder %s1258_s10, %s1254_s9 }
   0xd   : > { %s1364_s24 = scalar_select %p55_p4, %s1266_s12, %s57_s21  }
   0xe   : > { %s80_s25 = ssub.s32 %s1282_s16, %s1506_s20  ;;  %p96_p7 = scmp.eq.s32.totalorder %s871_s18, 3 }
   0xf   : > { %s82_s26 = sor.u32 %s80_s25, %s54_s22  ;;  %p874_p10 = scmp.ge.s32.totalorder %s1286_s17, 4 }
  0x10   : > { %p83_p8 = scmp.eq.s32.totalorder %s82_s26, 0  ;;  %p1370_p9 = por %p96_p7, %p95_p6 }
  0x11   : > { %118 = sbr.rel (%p874_p10) target bundleno = 38 (0x26), region = 16 }
  0x12   : > { %s1375_s28 = scalar_select %p83_p8, %s1258_s10, %s85_s23  }
  0x18   : > { %130 = sbr.rel (!%p66_p5) target bundleno = 38 (0x26), region = 24  ;;  %s132_s29 = sand.u32 (%p66_p5), 1, %s1266_s12  }
  0x19   : > { %s876_s30 = sshll.u32 (%p66_p5), %s1278_s15, 2  ;;  %s875_s3 = sshll.u32 (%p66_p5), %s132_s29, 6 }
  0x1a   : > { %s1383_s6 = scalar_lea.vmem (%p66_p5), %s1490_s1, %s876_s30  ;;  %s134_s7 = scalar_lea.vmem (%p66_p5), [#allocation2], %s875_s3 }
  0x1b   : > { %v152_v0 = vld [vmem:[%s1383_s6] sm:$0xf] (%p66_p5)  ;;  %v154_v1 = vld [vmem:[%s1383_s6 + $0x8] sm:$0xf] (%p66_p5)  ;;  %v156_v2 = vld [vmem:[%s1383_s6 + $0x10] sm:$0xf] (%p66_p5) }
  0x1c   : > { %153 = vst [vmem:[%s134_s7] sm:$0xf] (%p66_p5), %v152_v0  ;;  %155 = vst [vmem:[%s134_s7 + $0x4] sm:$0xf] (%p66_p5), %v154_v1  ;;  %v158_v3 = vld [vmem:[%s1383_s6 + $0x18] sm:$0xf] (%p66_p5) }
  0x1d   : > { %v160_v4 = vld [vmem:[%s1383_s6 + $0x20] sm:$0xf] (%p66_p5)  ;;  %157 = vst [vmem:[%s134_s7 + $0x8] sm:$0xf] (%p66_p5), %v156_v2  ;;  %159 = vst [vmem:[%s134_s7 + $0xc] sm:$0xf] (%p66_p5), %v158_v3 }
  0x1e   : > { %161 = vst [vmem:[%s134_s7 + $0x10] sm:$0xf] (%p66_p5), %v160_v4  ;;  %v162_v5 = vld [vmem:[%s1383_s6 + $0x28] sm:$0xf] (%p66_p5)  ;;  %v164_v6 = vld [vmem:[%s1383_s6 + $0x30] sm:$0xf] (%p66_p5) }
  0x1f   : > { %v166_v7 = vld [vmem:[%s1383_s6 + $0x38] sm:$0xf]  ;;  %163 = vst [vmem:[%s134_s7 + $0x14] sm:$0xf] %v162_v5  ;;  %165 = vst [vmem:[%s134_s7 + $0x18] sm:$0xf] %v164_v6 }
  0x20   : > { %167 = vst [vmem:[%s134_s7 + $0x1c] sm:$0xf] %v166_v7  ;;  %v168_v8 = vld [vmem:[%s1383_s6 + $0x40] sm:$0xf]  ;;  %v170_v9 = vld [vmem:[%s1383_s6 + $0x48] sm:$0xf] }
  0x21   : > { %v172_v10 = vld [vmem:[%s1383_s6 + $0x50] sm:$0xf]  ;;  %169 = vst [vmem:[%s134_s7 + $0x20] sm:$0xf] %v168_v8  ;;  %171 = vst [vmem:[%s134_s7 + $0x24] sm:$0xf] %v170_v9 }
  0x22   : > { %173 = vst [vmem:[%s134_s7 + $0x28] sm:$0xf] %v172_v10  ;;  %v174_v11 = vld [vmem:[%s1383_s6 + $0x58] sm:$0xf]  ;;  %v176_v12 = vld [vmem:[%s1383_s6 + $0x60] sm:$0xf] }
  0x23   : > { %v178_v13 = vld [vmem:[%s1383_s6 + $0x68] sm:$0xf]  ;;  %175 = vst [vmem:[%s134_s7 + $0x2c] sm:$0xf] %v174_v11  ;;  %177 = vst [vmem:[%s134_s7 + $0x30] sm:$0xf] %v176_v12 }
  0x24   : > { %179 = vst [vmem:[%s134_s7 + $0x34] sm:$0xf] %v178_v13  ;;  %v180_v14 = vld [vmem:[%s1383_s6 + $0x70] sm:$0xf]  ;;  %v182_v15 = vld [vmem:[%s1383_s6 + $0x78] sm:$0xf] }
  0x25   : > { %181 = vst [vmem:[%s134_s7 + $0x38] sm:$0xf] %v180_v14  ;;  %183 = vst [vmem:[%s134_s7 + $0x3c] sm:$0xf] %v182_v15 }
  0x26 PF: > { %p877_p11 = scmp.ge.s32.totalorder %s1286_s17, 1  ;;  %p237_p12 = scmp.lt.s32.totalorder %s1286_s17, 5 }
  0x28   : > { %p238_p13 = pnand %p877_p11, %p237_p12 }
  0x29   : > { %s244_s8 = sand.u32 (!%p238_p13), 1, %s1262_s11   ;;  %s880_s18 = sshll.u32 (!%p238_p13), %s1274_s14, 4 }
  0x2a   : > { %241 = sbr.rel (%p238_p13) target bundleno = 354 (0x162), region = 65  ;;  %s878_s21 = sshll.u32 (!%p238_p13), %s244_s8, 6 }
  0x2b   : > { %p270_p0 = scmp.lt.s32.totalorder (!%p238_p13), %s880_s18, 31  ;;  %s1405_s22 = scalar_lea.vmem (!%p238_p13), [#allocation2], %s878_s21 }
  0x2c   : > { %v1136_v16 = vld [vmem:[%s1405_s22] sm:$0xff] (!%p238_p13)   ;;  %v1137_v17 = vld [vmem:[%s1405_s22 + $0x8] sm:$0xff] (!%p238_p13)   ;;  %v1138_v18 = vld [vmem:[%s1405_s22 + $0x10] sm:$0xff] (!%p238_p13)   ;;  %s266_s29 = sand.u32 (!%p238_p13), 1, %s1254_s9  }
  0x2d   : > { %1016 = vmatprep.subr.bf16.mxu0 (!%p238_p13), %v1136_v16  ;;  %1048 = vmatprep.subr.bf16.mxu1 (!%p238_p13), %v1136_v16  ;;  %v1139_v19 = vld [vmem:[%s1405_s22 + $0x18] sm:$0xff] (!%p238_p13)   ;;  %v1140_v22 = vld [vmem:[%s1405_s22 + $0x20] sm:$0xff] (!%p238_p13)   ;;  %v1141_v23 = vld [vmem:[%s1405_s22 + $0x28] sm:$0xff] (!%p238_p13)   ;;  %s879_s30 = sshll.u32 (!%p238_p13), %s266_s29, 6 }
  0x2e   : > { %1017 = vmatpush3.bf16.msra.mxu0 (!%p238_p13), %v1136_v16  ;;  %1056 = vmatpush3.bf16.msra.mxu1 (!%p238_p13), %v1136_v16  ;;  %v1142_v24 = vld [vmem:[%s1405_s22 + $0x30] sm:$0xff] (!%p238_p13)   ;;  %v1143_v25 = vld [vmem:[%s1405_s22 + $0x38] sm:$0xff] (!%p238_p13)   ;;  %s1429_s9 = scalar_lea.vmem (!%p238_p13), [#allocation3], %s879_s30 }
  0x2f   : > { %1018 = vmatprep.subr.bf16.mxu0 (!%p238_p13), %v1137_v17  ;;  %1049 = vmatprep.subr.bf16.mxu1 (!%p238_p13), %v1137_v17 }
  0x31   : > { %s1508_s18 = smov (!%p270_p0, %s880_s18), 31  ;;  %s952_s3 = sshll.u32 (%p1370_p9), %s1274_s14, 5 }
  0x32   : > { %s881_s23 = sshll.u32 %s1508_s18, 2  ;;  %1019 = vmatpush3.bf16.msra.mxu0 %v1137_v17  ;;  %1057 = vmatpush3.bf16.msra.mxu1 %v1137_v17  ;;  %s687_s4 = sadd.s32 (%p1370_p9), %s1270_s13, %s952_s3 }
  0x33   : > { %s1413_s26 = scalar_lea.vmem %s1489_s0, %s881_s23  ;;  %1020 = vmatprep.subr.bf16.mxu0 %v1138_v18  ;;  %1050 = vmatprep.subr.bf16.mxu1 %v1138_v18  ;;  %s933_s27 = sshll.u32 (%p1370_p9), %s687_s4, 2 }
  0x34   : > { %v1144_v20 = vld [vmem:[%s1413_s26] sm:$0xff]   ;;  %v1146_v26 = vld [vmem:[%s1413_s26 + $0x8] sm:$0xff]   ;;  %v1148_v28 = vld [vmem:[%s1413_s26 + $0x10] sm:$0xff]   ;;  %s689_s7 = scalar_lea.vmem (%p1370_p9), %s1491_s2, %s933_s27 }
  0x35   : > { %v1145_v21 = vld [vmem:[%s1413_s26 + $0x20] sm:$0xff]   ;;  %1032 = vmatprep.mubr.bf16.mxu0 %v1144_v20  ;;  %v1147_v27 = vld [vmem:[%s1413_s26 + $0x28] sm:$0xff]   ;;  %v1149_v29 = vld [vmem:[%s1413_s26 + $0x30] sm:$0xff]  }
  0x36   : > { %1021 = vmatpush3.bf16.msra.mxu0 %v1138_v18  ;;  %1058 = vmatpush3.bf16.msra.mxu1 %v1138_v18  ;;  %v1150_v30 = vld [vmem:[%s1413_s26 + $0x18] sm:$0xff]  }
  0x37   : > { %1022 = vmatprep.subr.bf16.mxu0 %v1139_v19  ;;  %1051 = vmatprep.subr.bf16.mxu1 %v1139_v19  ;;  %v1151_v31 = vld [vmem:[%s1413_s26 + $0x38] sm:$0xff]  }
  0x38   : > { %1040 = vmatprep.mubr.bf16.mxu1 %v1145_v21 }
  0x3a   : > { %1023 = vmatpush3.bf16.msra.mxu0 %v1139_v19  ;;  %1059 = vmatpush3.bf16.msra.mxu1 %v1139_v19 }
  0x3b   : > { %1024 = vmatprep.subr.bf16.mxu0 %v1140_v22  ;;  %1052 = vmatprep.subr.bf16.mxu1 %v1140_v22 }
  0x3e   : > { %1025 = vmatpush3.bf16.msra.mxu0 %v1140_v22  ;;  %1060 = vmatpush3.bf16.msra.mxu1 %v1140_v22 }
  0x3f   : > { %1026 = vmatprep.subr.bf16.mxu0 %v1141_v23  ;;  %1053 = vmatprep.subr.bf16.mxu1 %v1141_v23 }
  0x42   : > { %1027 = vmatpush3.bf16.msra.mxu0 %v1141_v23  ;;  %1061 = vmatpush3.bf16.msra.mxu1 %v1141_v23 }
  0x43   : > { %1028 = vmatprep.subr.bf16.mxu0 %v1142_v24  ;;  %1054 = vmatprep.subr.bf16.mxu1 %v1142_v24 }
  0x46   : > { %1029 = vmatpush3.bf16.msra.mxu0 %v1142_v24  ;;  %1062 = vmatpush3.bf16.msra.mxu1 %v1142_v24 }
  0x47   : > { %1030 = vmatprep.subr.bf16.mxu0 %v1143_v25  ;;  %1055 = vmatprep.subr.bf16.mxu1 %v1143_v25 }
  0x4a   : > { %1031 = vmatpush3.bf16.msra.mxu0 %v1143_v25  ;;  %1063 = vmatpush3.bf16.msra.mxu1 %v1143_v25 }
  0x4d   : > { %1033 = vmatmul.mubr.bf16.vlgmr.msra.gmra.mrb[0].mxu0 %v1146_v26  ;;  %1041 = vmatmul.mubr.bf16.vlgmr.msra.gmra.mrb[0].mxu1 %v1147_v27 }
  0x4e   : > { %1036 = vmatprep.mubr.bf16.mxu0 %v1148_v28  ;;  %1044 = vmatprep.mubr.bf16.mxu1 %v1149_v29 }
  0x55   : > { %1037 = vmatmul.mubr.bf16.gmra.mrb[4].mxu0 %v1150_v30  ;;  %1045 = vmatmul.mubr.bf16.gmra.mrb[4].mxu1 %v1151_v31 }
 0x120   : > { %v1034_v32 = vpop.f32.mrb[0].mxu0  ;;  %v1042_v33 = vpop.f32.mrb[0].mxu1 }
 0x121   : > { %v900_v34 = vmul.f32 -1.442695, %v1034_v32  ;;  %v908_v35 = vmul.f32 -1.442695, %v1042_v33  ;;  %v439_v36 = vpop.f32.mrb[1].mxu0  ;;  %v471_v37 = vpop.f32.mrb[1].mxu1 }
 0x122   : > { %v898_v38 = vmul.f32 -1.442695, %v439_v36  ;;  %v906_v39 = vmul.f32 -1.442695, %v471_v37  ;;  %v1035_v40 = vpop.f32.mrb[2].mxu0  ;;  %v1043_v41 = vpop.f32.mrb[2].mxu1 }
 0x123   : > { %1152 = vpow2.f32 %v900_v34  ;;  %v901_v42 = vmul.f32 -1.442695, %v1035_v40  ;;  %v442_v43 = vpop.f32.mrb[3].mxu0  ;;  %v474_v44 = vpop.f32.mrb[3].mxu1  ;;  %v909_v45 = vmul.f32 -1.442695, %v1043_v41 }
 0x124   : > { %1154 = vpow2.f32 %v908_v35  ;;  %v899_v46 = vmul.f32 -1.442695, %v442_v43  ;;  %v907_v47 = vmul.f32 -1.442695, %v474_v44 }
 0x125   : > { %1156 = vpow2.f32 %v898_v38 }
 0x126   : > { %1158 = vpow2.f32 %v906_v39 }
 0x127   : > { %1160 = vpow2.f32 %v901_v42 }
 0x128   : > { %1162 = vpow2.f32 %v909_v45  ;;  %v1038_v48 = vpop.f32.mrb[4].mxu0  ;;  %v1046_v49 = vpop.f32.mrb[4].mxu1 }
 0x129   : > { %1164 = vpow2.f32 %v899_v46  ;;  %v904_v50 = vmul.f32 -1.442695, %v1038_v48  ;;  %v912_v51 = vmul.f32 -1.442695, %v1046_v49  ;;  %v455_v52 = vpop.f32.mrb[5].mxu0  ;;  %v487_v53 = vpop.f32.mrb[5].mxu1 }
 0x12a   : > { %1166 = vpow2.f32 %v907_v47  ;;  %v902_v54 = vmul.f32 -1.442695, %v455_v52  ;;  %v1039_v55 = vpop.f32.mrb[6].mxu0  ;;  %v1047_v56 = vpop.f32.mrb[6].mxu1  ;;  %v910_v11 = vmul.f32 -1.442695, %v487_v53 }
 0x12b   : > { %1168 = vpow2.f32 %v904_v50  ;;  %v905_v57 = vmul.f32 -1.442695, %v1039_v55  ;;  %v458_v58 = vpop.f32.mrb[7].mxu0  ;;  %v490_v59 = vpop.f32.mrb[7].mxu1  ;;  %v913_v18 = vmul.f32 -1.442695, %v1047_v56 }
 0x12c   : > { %1170 = vpow2.f32 %v912_v51  ;;  %v903_v21 = vmul.f32 -1.442695, %v458_v58  ;;  %v911_v23 = vmul.f32 -1.442695, %v490_v59 }
 0x12d   : > { %v1153_v60 = vpop.eup %1152  ;;  %1172 = vpow2.f32 %v902_v54 }
 0x12e   : > { %v1155_v61 = vpop.eup %1154  ;;  %v552_v62 = vadd.f32 1.0, %v1153_v60  ;;  %1174 = vpow2.f32 %v905_v57 }
 0x12f   : > { %v1157_v63 = vpop.eup %1156  ;;  %v560_v0 = vadd.f32 1.0, %v1155_v61 }
 0x130   : > { %v1159_v1 = vpop.eup %1158  ;;  %1176 = vrcp.f32 %v552_v62  ;;  %v550_v2 = vadd.f32 1.0, %v1157_v63 }
 0x131   : > { %v1161_v3 = vpop.eup %1160  ;;  %1178 = vrcp.f32 %v560_v0  ;;  %v558_v4 = vadd.f32 1.0, %v1159_v1 }
 0x132   : > { %v1163_v5 = vpop.eup %1162  ;;  %1180 = vrcp.f32 %v550_v2  ;;  %v553_v6 = vadd.f32 1.0, %v1161_v3 }
 0x133   : > { %v1165_v7 = vpop.eup %1164  ;;  %1182 = vrcp.f32 %v558_v4  ;;  %v561_v8 = vadd.f32 1.0, %v1163_v5 }
 0x134   : > { %v1167_v9 = vpop.eup %1166  ;;  %1184 = vrcp.f32 %v553_v6  ;;  %v551_v10 = vadd.f32 1.0, %v1165_v7 }
 0x135   : > { %v1169_v12 = vpop.eup %1168  ;;  %1186 = vrcp.f32 %v561_v8  ;;  %v559_v13 = vadd.f32 1.0, %v1167_v9 }
 0x136   : > { %1188 = vrcp.f32 %v551_v10  ;;  %v1171_v14 = vpop.eup %1170  ;;  %v556_v15 = vadd.f32 1.0, %v1169_v12 }
 0x137   : > { %1190 = vrcp.f32 %v559_v13  ;;  %v1173_v16 = vpop.eup %1172  ;;  %v564_v35 = vadd.f32 1.0, %v1171_v14 }
 0x138   : > { %1192 = vpow2.f32 %v910_v11  ;;  %v1175_v17 = vpop.eup %1174  ;;  %v554_v36 = vadd.f32 1.0, %v1173_v16 }
 0x139   : > { %v557_v20 = vadd.f32 1.0, %v1175_v17  ;;  %1194 = vrcp.f32 %v556_v15 }
 0x13a   : > { %v1177_v19 = vpop.eup %1176 }
 0x13b   : > { %v1179_v22 = vpop.eup %1178  ;;  %1196 = vrcp.f32 %v557_v20 }
 0x13c   : > { %v1181_v24 = vpop.eup %1180  ;;  %1198 = vpow2.f32 %v913_v18 }
 0x13d   : > { %v1183_v25 = vpop.eup %1182  ;;  %1200 = vpow2.f32 %v903_v21 }
 0x13e   : > { %v1185_v26 = vpop.eup %1184  ;;  %1202 = vpow2.f32 %v911_v23 }
 0x13f   : > { %v1187_v27 = vpop.eup %1186  ;;  %v961_v28 = vpack.c.bf16 %v1185_v26, %v1177_v19  ;;  %1204 = vrcp.f32 %v564_v35 }
 0x140   : > { %v1189_v29 = vpop.eup %1188  ;;  %v981_v30 = vpack.c.bf16 %v1187_v27, %v1179_v22  ;;  %1206 = vrcp.f32 %v554_v36 }
 0x141   : > { %v1191_v31 = vpop.eup %1190  ;;  %993 = vst [vmem:[%s1429_s9 + $0x8] sm:$0xff] %v961_v28   ;;  %v956_v32 = vpack.c.bf16 %v1189_v29, %v1181_v24 }
 0x142   : > { %v1193_v33 = vpop.eup %1192  ;;  %997 = vst [vmem:[%s1429_s9 + $0x28] sm:$0xff] %v981_v30   ;;  %v976_v34 = vpack.c.bf16 %v1191_v31, %v1183_v25 }
 0x143   : > { %957 = vst [vmem:[%s1429_s9] sm:$0xff] %v956_v32   ;;  %v1195_v37 = vpop.eup %1194  ;;  %v562_v38 = vadd.f32 1.0, %v1193_v33 }
 0x144   : > { %996 = vst [vmem:[%s1429_s9 + $0x20] sm:$0xff] %v976_v34  }
 0x145   : > { %v1197_v39 = vpop.eup %1196  ;;  %1208 = vrcp.f32 %v562_v38 }
 0x146   : > { %v1199_v40 = vpop.eup %1198  ;;  %v971_v41 = vpack.c.bf16 %v1197_v39, %v1195_v37 }
 0x147   : > { %v1201_v42 = vpop.eup %1200  ;;  %v565_v43 = vadd.f32 1.0, %v1199_v40 }
 0x148   : > { %v1203_v44 = vpop.eup %1202  ;;  %995 = vst [vmem:[%s1429_s9 + $0x18] sm:$0xff] %v971_v41   ;;  %v555_v45 = vadd.f32 1.0, %v1201_v42  ;;  %v709_v58 = vld [vmem:[%s1429_s9 + $0x8] sm:$0xf] (%p1370_p9)  ;;  %v711_v59 = vld [vmem:[%s1429_s9 + $0xc] sm:$0xf] (%p1370_p9) }
 0x149   : > { %1210 = vrcp.f32 %v565_v43  ;;  %v563_v46 = vadd.f32 1.0, %v1203_v44  ;;  %v1205_v47 = vpop.eup %1204  ;;  %710 = vst [vmem:[%s689_s7 + $0x10] sm:$0xf] (%p1370_p9), %v709_v58  ;;  %712 = vst [vmem:[%s689_s7 + $0x18] sm:$0xf] (%p1370_p9), %v711_v59 }
 0x14a   : > { %1212 = vrcp.f32 %v555_v45  ;;  %v1207_v48 = vpop.eup %1206  ;;  %v705_v56 = vld [vmem:[%s1429_s9] sm:$0xf] (%p1370_p9)  ;;  %v707_v57 = vld [vmem:[%s1429_s9 + $0x4] sm:$0xf] (%p1370_p9)  ;;  %v725_v2 = vld [vmem:[%s1429_s9 + $0x28] sm:$0xf] (%p1370_p9) }
 0x14b   : > { %1214 = vrcp.f32 %v563_v46  ;;  %v721_v0 = vld [vmem:[%s1429_s9 + $0x20] sm:$0xf] (%p1370_p9)  ;;  %v723_v1 = vld [vmem:[%s1429_s9 + $0x24] sm:$0xf] (%p1370_p9)  ;;  %706 = vst [vmem:[%s689_s7] sm:$0xf] (%p1370_p9), %v705_v56 }
 0x14c   : > { %708 = vst [vmem:[%s689_s7 + $0x8] sm:$0xf] (%p1370_p9), %v707_v57  ;;  %722 = vst [vmem:[%s689_s7 + $0x40] sm:$0xf] (%p1370_p9), %v721_v0  ;;  %v727_v3 = vld [vmem:[%s1429_s9 + $0x2c] sm:$0xf] (%p1370_p9) }
 0x14d   : > { %724 = vst [vmem:[%s689_s7 + $0x48] sm:$0xf] (%p1370_p9), %v723_v1  ;;  %726 = vst [vmem:[%s689_s7 + $0x50] sm:$0xf] (%p1370_p9), %v725_v2 }
 0x14e   : > { %728 = vst [vmem:[%s689_s7 + $0x58] sm:$0xf] (%p1370_p9), %v727_v3 }
 0x14f   : > { %v1209_v49 = vpop.eup %1208  ;;  %v717_v62 = vld [vmem:[%s1429_s9 + $0x18] sm:$0xf] (%p1370_p9)  ;;  %v719_v63 = vld [vmem:[%s1429_s9 + $0x1c] sm:$0xf] (%p1370_p9) }
 0x150   : > { %718 = vst [vmem:[%s689_s7 + $0x30] sm:$0xf] (%p1370_p9), %v717_v62  ;;  %720 = vst [vmem:[%s689_s7 + $0x38] sm:$0xf] (%p1370_p9), %v719_v63 }
 0x152   : > { %684 = sbr.rel (!%p1370_p9) target bundleno = 354 (0x162), region = 73 }
 0x153   : > { %v1211_v50 = vpop.eup %1210 }
 0x154   : > { %v1213_v51 = vpop.eup %1212  ;;  %v991_v52 = vpack.c.bf16 %v1211_v50, %v1205_v47 }
 0x155   : > { %v1215_v53 = vpop.eup %1214  ;;  %v966_v54 = vpack.c.bf16 %v1213_v51, %v1207_v48 }
 0x156   : > { %999 = vst [vmem:[%s1429_s9 + $0x38] sm:$0xff] %v991_v52   ;;  %v986_v55 = vpack.c.bf16 %v1215_v53, %v1209_v49 }
 0x157   : > { %994 = vst [vmem:[%s1429_s9 + $0x10] sm:$0xff] %v966_v54  }
 0x158   : > { %998 = vst [vmem:[%s1429_s9 + $0x30] sm:$0xff] %v986_v55  }
 0x15d   : > { %v733_v6 = vld [vmem:[%s1429_s9 + $0x38] sm:$0xf]  ;;  %v735_v7 = vld [vmem:[%s1429_s9 + $0x3c] sm:$0xf] }
 0x15e   : > { %v713_v60 = vld [vmem:[%s1429_s9 + $0x10] sm:$0xf]  ;;  %v715_v61 = vld [vmem:[%s1429_s9 + $0x14] sm:$0xf]  ;;  %734 = vst [vmem:[%s689_s7 + $0x70] sm:$0xf] %v733_v6 }
 0x15f   : > { %714 = vst [vmem:[%s689_s7 + $0x20] sm:$0xf] %v713_v60  ;;  %716 = vst [vmem:[%s689_s7 + $0x28] sm:$0xf] %v715_v61  ;;  %v729_v4 = vld [vmem:[%s1429_s9 + $0x30] sm:$0xf] }
 0x160   : > { %730 = vst [vmem:[%s689_s7 + $0x60] sm:$0xf] %v729_v4  ;;  %v731_v5 = vld [vmem:[%s1429_s9 + $0x34] sm:$0xf]  ;;  %736 = vst [vmem:[%s689_s7 + $0x78] sm:$0xf] %v735_v7 }
 0x161   : > { %732 = vst [vmem:[%s689_s7 + $0x68] sm:$0xf] %v731_v5 }
 0x162 PF: > { %s12_s17 = sadd.s32 1, %s1286_s17   ;;  %s1493_s9 = smov %s1258_s10 }
 0x163   : > { %p9_p1 = scmp.ge.s32.totalorder %s12_s17, 6   ;;  %s1494_s10 = smov %s1375_s28 }
 0x164   : > { %s1495_s11 = smov %s1266_s12  ;;  %s1496_s12 = smov %s1364_s24 }
 0x165   : > { %s1497_s13 = smov %s1278_s15  ;;  %s1498_s14 = smov %s1282_s16 }
 0x166   : > { %s1499_s15 = smov %s1502_s19  ;;  %s1500_s16 = smov %s1506_s20 }
 0x167   :  { %11 = sbr.rel (!%p9_p1) target bundleno = 5 (0x5), region = 148 }

</bundles_post_ra>
